<compile_context>
chip_gen: v7x
topology: tpu7x:2x2x1
jax: 0.10.0
libtpu: 0.0.40
codegen_flags: <defaults>
</compile_context>

<pallas_src>
import functools

import jax
import jax.numpy as jnp
from jax.experimental import pallas as pl
from jax.experimental.pallas import tpu as pltpu

HIDDEN_SIZE = 32
INPUT_DIM = 1
NUM_LAYERS = 2

# Operand dtype fed to the MXU.  jnp.float32 preserves PyTorch-exact forward
# numerics; set to jnp.bfloat16 on v6e/v7x for lower per-step MXU latency
# (results then deviate beyond last-ulp -- gate behind a tolerance check).
MATMUL_DTYPE = jnp.float32


def _lstm_kernel(x_ref, h0_ref, c0_ref, wp_ref,
                 y_ref, hn_ref, cn_ref,
                 addp_ref, hstash_ref,
                 *, hidden_size):
    H = hidden_size
    H2, H4, H6, H8 = 2 * H, 4 * H, 6 * H, 8 * H
    batch = h0_ref.shape[1]
    seq_len = hstash_ref.shape[0]

    # ---- packed weights (row layout built in the wrapper) -------------------
    #   rows [0, 2H)   : W_comb, fused/skewed, column-permuted      (2H, 8H)
    #   row  2H        : x coefficient (W_ih_l0^T in l0 cols, 0 in l1 cols)
    #   row  2H + 1    : fused biases  (b0 in l0 cols, b1 in l1 cols)
    #   row  2H + 2    : w_out, zero-padded over the layer-0 lanes  (first 2H)
    #   row  2H + 3    : b_out (lane 0)
    wcomb = wp_ref[0:H2, :].astype(MATMUL_DTYPE)        # hoisted load (+cast) out of loop
    wih0p = wp_ref[H2:H2 + 1, :]                        # (1, 8H)
    bp = wp_ref[H2 + 1:H2 + 2, :]                       # (1, 8H)
    woutp = wp_ref[H2 + 2:H2 + 3, 0:H2]                 # (1, 2H)
    bout = wp_ref[H2 + 3:H2 + 4, 0:1]                   # (1, 1)

    # Per-step additive gate term for ALL timesteps at once (input_dim == 1 =>
    # pure VPU broadcast multiply; layer-0 columns get x[t]*W_ih_l0 + b0, the
    # layer-1 columns get b1).  Off the serial chain.
    # x_ref is (seq+1, batch, 1); row seq is a zero pad (feeds a discarded step).
    addp_ref[...] = x_ref[...] * wih0p[None, :, :] + bp[None, :, :]

    def packed_cell(gates, c_prev):
        # gates: (batch, 8H), permuted column blocks [i0,i1,f0,f1,o0,o1,g0,g1].
        # c_prev / returns: (batch, 2H) lane-packed [layer0 | layer1].
        sig = jax.nn.sigmoid(gates[:, 0:H6])            # one EUP pass for i,f,o
        i = sig[:, 0:H2]
        f = sig[:, H2:H4]
        o = sig[:, H4:H6]
        g = jnp.tanh(gates[:, H6:H8])
        c_new = f * c_prev + i * g
        h_new = o * jnp.tanh(c_new)
        return h_new, c_new

    # ---- prologue: layer-0 step 0 + gates for the first skewed iteration ----
    h_pk = jnp.concatenate([h0_ref[0], h0_ref[1]], axis=-1)   # (batch, 2H), one-time
    c_pk = jnp.concatenate([c0_ref[0], c0_ref[1]], axis=-1)

    # Fused matmul's layer-1 columns here use the *initial* layer-0 hidden
    # (wrong for g1[0]) -> the layer-1 half of this cell update is reverted.
    gates = jnp.dot(h_pk.astype(MATMUL_DTYPE), wcomb,
                    preferred_element_type=jnp.float32) + addp_ref[0]
    h_new, c_new = packed_cell(gates, c_pk)
    is_l0 = jax.lax.broadcasted_iota(jnp.int32, (batch, H2), 1) < H
    h_pk = jnp.where(is_l0, h_new, h_pk)                # [h_l0[0] | h0_l1]
    c_pk = jnp.where(is_l0, c_new, c_pk)                # [c_l0[0] | c0_l1]

    # gates for skewed iteration 0: (g0[1] | g1[0]).
    gates = jnp.dot(h_pk.astype(MATMUL_DTYPE), wcomb,
                    preferred_element_type=jnp.float32) + addp_ref[1]

    # ---- skewed recurrence: iteration k does layer-0 step k+1 + layer-1 step k
    def body(k, carry):
        gates, _h_prev, c_pk = carry
        h_new, c_new = packed_cell(gates, c_pk)         # [h_l0[k+1] | h_l1[k]]
        hstash_ref[k] = h_new                           # lanes [H,2H) = h_l1[k]
        # The ONE MXU op on the serial chain: layer-0 columns -> recurrent part
        # of g0[k+2]; layer-1 columns -> g1[k+1] (pre-bias).
        gg = jnp.dot(h_new.astype(MATMUL_DTYPE), wcomb,
                     preferred_element_type=jnp.float32)
        gates_next = gg + addp_ref[k + 2]
        return gates_next, h_new, c_new

    unroll = max(1, min(seq_len - 1, 32))
    gates, h_pk, c_pk = jax.lax.fori_loop(0, seq_len - 1, body,
                                          (gates, h_pk, c_pk), unroll=unroll)
    # After the loop: h_pk = [h_l0[T-1] | h_l1[T-2]], c_pk likewise,
    # gates = (g0[T] | g1[T-1]).

    # ---- epilogue: layer-1 step T-1 (the layer-0 half is discarded) ----------
    h_last, c_last = packed_cell(gates, c_pk)
    hstash_ref[seq_len - 1] = h_last                    # lanes [H,2H) = h_l1[T-1]

    hn_ref[0] = h_pk[:, 0:H]                            # h_l0[T-1]
    cn_ref[0] = c_pk[:, 0:H]
    hn_ref[1] = h_last[:, H:H2]                         # h_l1[T-1]
    cn_ref[1] = c_last[:, H:H2]

    # Output Linear hoisted out of the loop: w_out is zero over the layer-0
    # lanes, so the packed stash is reduced directly (no slicing).
    y_ref[...] = jnp.sum(hstash_ref[...] * woutp[None, :, :], axis=-1) + bout


def _pack_weights(params, hidden_size=HIDDEN_SIZE):
    """Fuse / transpose / permute all parameters into one (2H+4, 8H) f32 array."""
    H = hidden_size
    H2, H4, H8 = 2 * H, 4 * H, 8 * H

    whh0 = params["w_hh_l0"].T                          # (H, 4H)
    wih1 = params["w_ih_l1"].T                          # (H, 4H)
    whh1 = params["w_hh_l1"].T                          # (H, 4H)
    zeros = jnp.zeros((H, H4), jnp.float32)
    # rows [0,H) multiply h_l0, rows [H,2H) multiply h_l1;
    # cols [0,4H) = layer-0 gates (next step), cols [4H,8H) = layer-1 gates.
    w_unperm = jnp.concatenate(
        [jnp.concatenate([whh0, wih1], axis=1),
         jnp.concatenate([zeros, whh1], axis=1)], axis=0)          # (2H, 8H)

    wih0 = params["w_ih_l0"].T                          # (1, 4H)
    b0 = (params["b_ih_l0"] + params["b_hh_l0"]).reshape(1, H4)
    b1 = (params["b_ih_l1"] + params["b_hh_l1"]).reshape(1, H4)
    wih0_unperm = jnp.concatenate([wih0, jnp.zeros((1, H4), jnp.float32)], axis=1)
    b_unperm = jnp.concatenate([b0, b1], axis=1)        # (1, 8H)

    # Column permutation (H-wide blocks): new order [i0,i1,f0,f1,o0,o1,g0,g1]
    # from PyTorch order [i0,f0,g0,o0 | i1,f1,g1,o1] -> contiguous slices in
    # the packed cell update.
    order = (0, 4, 1, 5, 3, 7, 2, 6)
    perm = jnp.concatenate([jnp.arange(H) + b * H for b in order])
    wcomb = w_unperm[:, perm]
    wih0p = wih0_unperm[:, perm]
    bp = b_unperm[:, perm]

    # Output Linear: zero over the layer-0 lanes of the packed hidden.
    woutp = jnp.concatenate([jnp.zeros((1, H), jnp.float32),
                             params["w_out"].astype(jnp.float32)], axis=1)
    woutp = jnp.pad(woutp, ((0, 0), (0, H8 - H2)))
    boutp = jnp.pad(params["b_out"].reshape(1, 1).astype(jnp.float32),
                    ((0, 0), (0, H8 - 1)))

    wp = jnp.concatenate([wcomb, wih0p, bp, woutp, boutp], axis=0)
    return wp.astype(jnp.float32)                       # (2H + 4, 8H)


def init_params(key, input_dim=INPUT_DIM, hidden_size=HIDDEN_SIZE):
    """Deterministic parameter init mimicking PyTorch's uniform(-1/sqrt(H), 1/sqrt(H))."""
    H = hidden_size
    k = 1.0 / jnp.sqrt(jnp.float32(H))
    keys = jax.random.split(key, 10)
    u = lambda kk, shape: jax.random.uniform(kk, shape, jnp.float32, -k, k)
    return {
        "w_ih_l0": u(keys[0], (4 * H, input_dim)),
        "w_hh_l0": u(keys[1], (4 * H, H)),
        "b_ih_l0": u(keys[2], (4 * H,)),
        "b_hh_l0": u(keys[3], (4 * H,)),
        "w_ih_l1": u(keys[4], (4 * H, H)),
        "w_hh_l1": u(keys[5], (4 * H, H)),
        "b_ih_l1": u(keys[6], (4 * H,)),
        "b_hh_l1": u(keys[7], (4 * H,)),
        "w_out": u(keys[8], (1, H)),
        "b_out": u(keys[9], (1,)),
    }


@jax.jit
def lstm_demo_forward(x, h_0, c_0, params):
    """x: (seq, batch, 1); h_0, c_0: (num_layers, batch, hidden).
    Returns (y, (h_n, c_n)) with y: (seq, batch, 1)."""
    seq_len, batch, input_dim = x.shape
    assert input_dim == 1, "LstmDemo uses input_dim == 1"
    H = HIDDEN_SIZE
    H2, H8 = 2 * H, 8 * H

    wp = _pack_weights(params, H)

    # One zero pad timestep: the skewed loop's last iteration reads the additive
    # gate term one step ahead; the padded row only feeds a discarded update.
    x_ext = jnp.concatenate(
        [x.astype(jnp.float32), jnp.zeros((1, batch, 1), jnp.float32)], axis=0)

    vmem = pl.BlockSpec(memory_space=pltpu.MemorySpace.VMEM)
    kernel = functools.partial(_lstm_kernel, hidden_size=H)

    y2d, h_n, c_n = pl.pallas_call(
        kernel,
        out_shape=(
            jax.ShapeDtypeStruct((seq_len, batch), jnp.float32),
            jax.ShapeDtypeStruct((NUM_LAYERS, batch, H), jnp.float32),
            jax.ShapeDtypeStruct((NUM_LAYERS, batch, H), jnp.float32),
        ),
        in_specs=[vmem, vmem, vmem, vmem],
        out_specs=(vmem, vmem, vmem),
        scratch_shapes=[
            pltpu.VMEM((seq_len + 1, batch, H8), jnp.float32),  # additive gate slab
            pltpu.VMEM((seq_len, batch, H2), jnp.float32),      # packed hidden stash
        ],
    )(x_ext, h_0.astype(jnp.float32), c_0.astype(jnp.float32), wp)

    y = y2d[..., None]          # lane-dense kernel output -> (seq, batch, 1)
    return y, (h_n, c_n)


@jax.jit
def _lstm_reference(x, h_0, c_0, params):
    """Pure-JAX reference mirroring torch.nn.LSTM(num_layers=2) + Linear."""
    H = HIDDEN_SIZE

    def cell(inp, h, c, w_ih, w_hh, b_ih, b_hh):
        gates = inp @ w_ih.T + h @ w_hh.T + b_ih + b_hh
        i = jax.nn.sigmoid(gates[:, 0:H])
        f = jax.nn.sigmoid(gates[:, H:2 * H])
        g = jnp.tanh(gates[:, 2 * H:3 * H])
        o = jax.nn.sigmoid(gates[:, 3 * H:4 * H])
        c_new = f * c + i * g
        return o * jnp.tanh(c_new), c_new

    def step(carry, x_t):
        h0l, c0l, h1l, c1l = carry
        h0l, c0l = cell(x_t, h0l, c0l, params["w_ih_l0"], params["w_hh_l0"],
                        params["b_ih_l0"], params["b_hh_l0"])
        h1l, c1l = cell(h0l, h1l, c1l, params["w_ih_l1"], params["w_hh_l1"],
                        params["b_ih_l1"], params["b_hh_l1"])
        y_t = h1l @ params["w_out"].T + params["b_out"]
        return (h0l, c0l, h1l, c1l), y_t

    init = (h_0[0], c_0[0], h_0[1], c_0[1])
    (h0l, c0l, h1l, c1l), ys = jax.lax.scan(step, init, x)
    return ys, (jnp.stack([h0l, h1l]), jnp.stack([c0l, c1l]))


if __name__ == "__main__":
    key = jax.random.PRNGKey(0)
    k_x, k_h, k_c, k_p = jax.random.split(key, 4)

    seq_len, batch = 8, 2
    x = jax.random.normal(k_x, (seq_len, batch, INPUT_DIM), dtype=jnp.float32)
    h_0 = jax.random.normal(k_h, (NUM_LAYERS, batch, HIDDEN_SIZE), dtype=jnp.float32)
    c_0 = jax.random.normal(k_c, (NUM_LAYERS, batch, HIDDEN_SIZE), dtype=jnp.float32)

    params = init_params(k_p)

    y, (h_n, c_n) = lstm_demo_forward(x, h_0, c_0, params)
    jax.block_until_ready((y, h_n, c_n))

    assert y.shape == (seq_len, batch, 1)
    assert h_n.shape == (NUM_LAYERS, batch, HIDDEN_SIZE)
    assert c_n.shape == (NUM_LAYERS, batch, HIDDEN_SIZE)

    # Tolerance check against a pure-JAX reference (fused biases / skewed
    # matmuls only reassociate f32 sums, so differences are last-ulp scale).
    y_ref, (h_ref, c_ref) = _lstm_reference(x, h_0, c_0, params)
    assert jnp.allclose(y, y_ref, atol=1e-4, rtol=1e-4)
    assert jnp.allclose(h_n, h_ref, atol=1e-4, rtol=1e-4)
    assert jnp.allclose(c_n, c_ref, atol=1e-4, rtol=1e-4)

    print("KERNEL_OK")
</pallas_src>

<mosaic_0001>
module attributes {stable_mosaic.version = 11 : i64} {
  func.func @_lstm_kernel(%arg0: memref<9x2x1xf32, #tpu.memory_space<vmem>>, %arg1: memref<2x2x32xf32, #tpu.memory_space<vmem>>, %arg2: memref<2x2x32xf32, #tpu.memory_space<vmem>>, %arg3: memref<68x256xf32, #tpu.memory_space<vmem>>, %arg4: memref<8x2xf32, #tpu.memory_space<vmem>>, %arg5: memref<2x2x32xf32, #tpu.memory_space<vmem>>, %arg6: memref<2x2x32xf32, #tpu.memory_space<vmem>>, %arg7: memref<9x2x256xf32, #tpu.memory_space<vmem>>, %arg8: memref<8x2x64xf32, #tpu.memory_space<vmem>>) attributes {dimension_semantics = [], scalar_prefetch = 0 : i64, scratch_operands = 2 : i64, tpu.core_type = #tpu.core_type<tc>} {
    %c0 = arith.constant 0 : index
    %c0_0 = arith.constant 0 : index
    %0 = vector.load %arg3[%c0, %c0_0] : memref<68x256xf32, #tpu.memory_space<vmem>>, vector<64x256xf32>
    %c64 = arith.constant 64 : index
    %c0_1 = arith.constant 0 : index
    %1 = vector.load %arg3[%c64, %c0_1] : memref<68x256xf32, #tpu.memory_space<vmem>>, vector<1x256xf32>
    %c65 = arith.constant 65 : index
    %c0_2 = arith.constant 0 : index
    %2 = vector.load %arg3[%c65, %c0_2] : memref<68x256xf32, #tpu.memory_space<vmem>>, vector<1x256xf32>
    %c66 = arith.constant 66 : index
    %c0_3 = arith.constant 0 : index
    %3 = vector.load %arg3[%c66, %c0_3] : memref<68x256xf32, #tpu.memory_space<vmem>>, vector<1x64xf32>
    %c67 = arith.constant 67 : index
    %c0_4 = arith.constant 0 : index
    %4 = vector.load %arg3[%c67, %c0_4] : memref<68x256xf32, #tpu.memory_space<vmem>>, vector<1x1xf32>
    %c0_5 = arith.constant 0 : index
    %c0_6 = arith.constant 0 : index
    %c0_7 = arith.constant 0 : index
    %5 = vector.load %arg0[%c0_5, %c0_6, %c0_7] : memref<9x2x1xf32, #tpu.memory_space<vmem>>, vector<9x2x1xf32>
    %6 = vector.shape_cast %1 : vector<1x256xf32> to vector<1x1x256xf32>
    %7 = vector.broadcast %5 : vector<9x2x1xf32> to vector<9x2x256xf32>
    %8 = vector.broadcast %6 : vector<1x1x256xf32> to vector<9x2x256xf32>
    %9 = arith.mulf %7, %8 : vector<9x2x256xf32>
    %10 = vector.shape_cast %2 : vector<1x256xf32> to vector<1x1x256xf32>
    %11 = vector.broadcast %10 : vector<1x1x256xf32> to vector<9x2x256xf32>
    %12 = arith.addf %9, %11 : vector<9x2x256xf32>
    %c0_8 = arith.constant 0 : index
    %c0_9 = arith.constant 0 : index
    %c0_10 = arith.constant 0 : index
    %13 = vector.load %arg7[%c0_8, %c0_9, %c0_10] : memref<9x2x256xf32, #tpu.memory_space<vmem>>, vector<9x2x256xf32>
    tpu.vector_store %arg7[%c0_8, %c0_9, %c0_10], %12 {strides = array<i32>} : memref<9x2x256xf32, #tpu.memory_space<vmem>>, vector<9x2x256xf32>,
    %c0_11 = arith.constant 0 : index
    %c0_12 = arith.constant 0 : index
    %c0_13 = arith.constant 0 : index
    %14 = vector.load %arg1[%c0_11, %c0_12, %c0_13] : memref<2x2x32xf32, #tpu.memory_space<vmem>>, vector<1x2x32xf32>
    %15 = vector.shape_cast %14 : vector<1x2x32xf32> to vector<2x32xf32>
    %c1 = arith.constant 1 : index
    %c0_14 = arith.constant 0 : index
    %c0_15 = arith.constant 0 : index
    %16 = vector.load %arg1[%c1, %c0_14, %c0_15] : memref<2x2x32xf32, #tpu.memory_space<vmem>>, vector<1x2x32xf32>
    %17 = vector.shape_cast %16 : vector<1x2x32xf32> to vector<2x32xf32>
    %18 = tpu.concatenate %15, %17 in 1 : vector<2x32xf32>, vector<2x32xf32> -> vector<2x64xf32>
    %c0_16 = arith.constant 0 : index
    %c0_17 = arith.constant 0 : index
    %c0_18 = arith.constant 0 : index
    %19 = vector.load %arg2[%c0_16, %c0_17, %c0_18] : memref<2x2x32xf32, #tpu.memory_space<vmem>>, vector<1x2x32xf32>
    %20 = vector.shape_cast %19 : vector<1x2x32xf32> to vector<2x32xf32>
    %c1_19 = arith.constant 1 : index
    %c0_20 = arith.constant 0 : index
    %c0_21 = arith.constant 0 : index
    %21 = vector.load %arg2[%c1_19, %c0_20, %c0_21] : memref<2x2x32xf32, #tpu.memory_space<vmem>>, vector<1x2x32xf32>
    %22 = vector.shape_cast %21 : vector<1x2x32xf32> to vector<2x32xf32>
    %23 = tpu.concatenate %20, %22 in 1 : vector<2x32xf32>, vector<2x32xf32> -> vector<2x64xf32>
    %cst = arith.constant dense<0.000000e+00> : vector<2x256xf32>
    %24 = tpu.matmul %18, %0, %cst {dimension_numbers = #tpu.dot_dimension_numbers<[1], [0], [0], [1], [0, 0, 1, 1], [], []>} : vector<2x64xf32>, vector<64x256xf32>, vector<2x256xf32> -> vector<2x256xf32>
    %c0_22 = arith.constant 0 : index
    %c0_23 = arith.constant 0 : index
    %c0_24 = arith.constant 0 : index
    %25 = vector.load %arg7[%c0_22, %c0_23, %c0_24] : memref<9x2x256xf32, #tpu.memory_space<vmem>>, vector<1x2x256xf32>
    %26 = vector.shape_cast %25 : vector<1x2x256xf32> to vector<2x256xf32>
    %27 = arith.addf %24, %26 : vector<2x256xf32>
    %28 = vector.extract_strided_slice %27 {offsets = [0, 0], sizes = [2, 192], strides = [1, 1]} : vector<2x256xf32> to vector<2x192xf32>
    %29 = arith.negf %28 : vector<2x192xf32>
    %30 = math.exp %29 : vector<2x192xf32>
    %cst_25 = arith.constant 1.000000e+00 : f32
    %31 = vector.broadcast %cst_25 : f32 to vector<2x192xf32>
    %32 = arith.addf %31, %30 : vector<2x192xf32>
    %33 = arith.divf %31, %32 : vector<2x192xf32>
    %34 = vector.extract_strided_slice %33 {offsets = [0, 0], sizes = [2, 64], strides = [1, 1]} : vector<2x192xf32> to vector<2x64xf32>
    %35 = vector.extract_strided_slice %33 {offsets = [0, 64], sizes = [2, 64], strides = [1, 1]} : vector<2x192xf32> to vector<2x64xf32>
    %36 = vector.extract_strided_slice %33 {offsets = [0, 128], sizes = [2, 64], strides = [1, 1]} : vector<2x192xf32> to vector<2x64xf32>
    %37 = vector.extract_strided_slice %27 {offsets = [0, 192], sizes = [2, 64], strides = [1, 1]} : vector<2x256xf32> to vector<2x64xf32>
    %38 = math.tanh %37 : vector<2x64xf32>
    %39 = arith.mulf %35, %23 : vector<2x64xf32>
    %40 = arith.mulf %34, %38 : vector<2x64xf32>
    %41 = arith.addf %39, %40 : vector<2x64xf32>
    %42 = math.tanh %41 : vector<2x64xf32>
    %43 = arith.mulf %36, %42 : vector<2x64xf32>
    %44 = tpu.iota {dimensions = array<i32: 1>} : vector<2x64xi32>
    %c32_i32 = arith.constant 32 : i32
    %45 = vector.broadcast %c32_i32 : i32 to vector<2x64xi32>
    %46 = arith.cmpi slt, %44, %45 : vector<2x64xi32>
    %47 = arith.select %46, %43, %18 : vector<2x64xi1>, vector<2x64xf32>
    %48 = arith.select %46, %41, %23 : vector<2x64xi1>, vector<2x64xf32>
    %cst_26 = arith.constant dense<0.000000e+00> : vector<2x256xf32>
    %49 = tpu.matmul %47, %0, %cst_26 {dimension_numbers = #tpu.dot_dimension_numbers<[1], [0], [0], [1], [0, 0, 1, 1], [], []>} : vector<2x64xf32>, vector<64x256xf32>, vector<2x256xf32> -> vector<2x256xf32>
    %c1_27 = arith.constant 1 : index
    %c0_28 = arith.constant 0 : index
    %c0_29 = arith.constant 0 : index
    %50 = vector.load %arg7[%c1_27, %c0_28, %c0_29] : memref<9x2x256xf32, #tpu.memory_space<vmem>>, vector<1x2x256xf32>
    %51 = vector.shape_cast %50 : vector<1x2x256xf32> to vector<2x256xf32>
    %52 = arith.addf %49, %51 : vector<2x256xf32>
    %c0_i32 = arith.constant 0 : i32
    %53 = vector.extract_strided_slice %52 {offsets = [0, 0], sizes = [2, 192], strides = [1, 1]} : vector<2x256xf32> to vector<2x192xf32>
    %54 = arith.negf %53 : vector<2x192xf32>
    %55 = math.exp %54 : vector<2x192xf32>
    %cst_30 = arith.constant 1.000000e+00 : f32
    %56 = vector.broadcast %cst_30 : f32 to vector<2x192xf32>
    %57 = arith.addf %56, %55 : vector<2x192xf32>
    %58 = arith.divf %56, %57 : vector<2x192xf32>
    %59 = vector.extract_strided_slice %58 {offsets = [0, 0], sizes = [2, 64], strides = [1, 1]} : vector<2x192xf32> to vector<2x64xf32>
    %60 = vector.extract_strided_slice %58 {offsets = [0, 64], sizes = [2, 64], strides = [1, 1]} : vector<2x192xf32> to vector<2x64xf32>
    %61 = vector.extract_strided_slice %58 {offsets = [0, 128], sizes = [2, 64], strides = [1, 1]} : vector<2x192xf32> to vector<2x64xf32>
    %62 = vector.extract_strided_slice %52 {offsets = [0, 192], sizes = [2, 64], strides = [1, 1]} : vector<2x256xf32> to vector<2x64xf32>
    %63 = math.tanh %62 : vector<2x64xf32>
    %64 = arith.mulf %60, %48 : vector<2x64xf32>
    %65 = arith.mulf %59, %63 : vector<2x64xf32>
    %66 = arith.addf %64, %65 : vector<2x64xf32>
    %67 = math.tanh %66 : vector<2x64xf32>
    %68 = arith.mulf %61, %67 : vector<2x64xf32>
    %69 = arith.index_cast %c0_i32 : i32 to index
    %c0_31 = arith.constant 0 : index
    %c0_32 = arith.constant 0 : index
    %70 = vector.load %arg8[%69, %c0_31, %c0_32] : memref<8x2x64xf32, #tpu.memory_space<vmem>>, vector<1x2x64xf32>
    %71 = vector.shape_cast %70 : vector<1x2x64xf32> to vector<2x64xf32>
    %72 = vector.shape_cast %68 : vector<2x64xf32> to vector<1x2x64xf32>
    tpu.vector_store %arg8[%69, %c0_31, %c0_32], %72 {strides = array<i32>} : memref<8x2x64xf32, #tpu.memory_space<vmem>>, vector<1x2x64xf32>,
    %cst_33 = arith.constant dense<0.000000e+00> : vector<2x256xf32>
    %73 = tpu.matmul %68, %0, %cst_33 {dimension_numbers = #tpu.dot_dimension_numbers<[1], [0], [0], [1], [0, 0, 1, 1], [], []>} : vector<2x64xf32>, vector<64x256xf32>, vector<2x256xf32> -> vector<2x256xf32>
    %c2_i32 = arith.constant 2 : i32
    %74 = arith.addi %c0_i32, %c2_i32 : i32
    %75 = arith.index_cast %74 : i32 to index
    %c0_34 = arith.constant 0 : index
    %c0_35 = arith.constant 0 : index
    %76 = vector.load %arg7[%75, %c0_34, %c0_35] : memref<9x2x256xf32, #tpu.memory_space<vmem>>, vector<1x2x256xf32>
    %77 = vector.shape_cast %76 : vector<1x2x256xf32> to vector<2x256xf32>
    %78 = arith.addf %73, %77 : vector<2x256xf32>
    %c1_i32 = arith.constant 1 : i32
    %79 = vector.extract_strided_slice %78 {offsets = [0, 0], sizes = [2, 192], strides = [1, 1]} : vector<2x256xf32> to vector<2x192xf32>
    %80 = arith.negf %79 : vector<2x192xf32>
    %81 = math.exp %80 : vector<2x192xf32>
    %cst_36 = arith.constant 1.000000e+00 : f32
    %82 = vector.broadcast %cst_36 : f32 to vector<2x192xf32>
    %83 = arith.addf %82, %81 : vector<2x192xf32>
    %84 = arith.divf %82, %83 : vector<2x192xf32>
    %85 = vector.extract_strided_slice %84 {offsets = [0, 0], sizes = [2, 64], strides = [1, 1]} : vector<2x192xf32> to vector<2x64xf32>
    %86 = vector.extract_strided_slice %84 {offsets = [0, 64], sizes = [2, 64], strides = [1, 1]} : vector<2x192xf32> to vector<2x64xf32>
    %87 = vector.extract_strided_slice %84 {offsets = [0, 128], sizes = [2, 64], strides = [1, 1]} : vector<2x192xf32> to vector<2x64xf32>
    %88 = vector.extract_strided_slice %78 {offsets = [0, 192], sizes = [2, 64], strides = [1, 1]} : vector<2x256xf32> to vector<2x64xf32>
    %89 = math.tanh %88 : vector<2x64xf32>
    %90 = arith.mulf %86, %66 : vector<2x64xf32>
    %91 = arith.mulf %85, %89 : vector<2x64xf32>
    %92 = arith.addf %90, %91 : vector<2x64xf32>
    %93 = math.tanh %92 : vector<2x64xf32>
    %94 = arith.mulf %87, %93 : vector<2x64xf32>
    %95 = arith.index_cast %c1_i32 : i32 to index
    %c0_37 = arith.constant 0 : index
    %c0_38 = arith.constant 0 : index
    %96 = vector.load %arg8[%95, %c0_37, %c0_38] : memref<8x2x64xf32, #tpu.memory_space<vmem>>, vector<1x2x64xf32>
    %97 = vector.shape_cast %96 : vector<1x2x64xf32> to vector<2x64xf32>
    %98 = vector.shape_cast %94 : vector<2x64xf32> to vector<1x2x64xf32>
    tpu.vector_store %arg8[%95, %c0_37, %c0_38], %98 {strides = array<i32>} : memref<8x2x64xf32, #tpu.memory_space<vmem>>, vector<1x2x64xf32>,
    %cst_39 = arith.constant dense<0.000000e+00> : vector<2x256xf32>
    %99 = tpu.matmul %94, %0, %cst_39 {dimension_numbers = #tpu.dot_dimension_numbers<[1], [0], [0], [1], [0, 0, 1, 1], [], []>} : vector<2x64xf32>, vector<64x256xf32>, vector<2x256xf32> -> vector<2x256xf32>
    %c2_i32_40 = arith.constant 2 : i32
    %100 = arith.addi %c1_i32, %c2_i32_40 : i32
    %101 = arith.index_cast %100 : i32 to index
    %c0_41 = arith.constant 0 : index
    %c0_42 = arith.constant 0 : index
    %102 = vector.load %arg7[%101, %c0_41, %c0_42] : memref<9x2x256xf32, #tpu.memory_space<vmem>>, vector<1x2x256xf32>
    %103 = vector.shape_cast %102 : vector<1x2x256xf32> to vector<2x256xf32>
    %104 = arith.addf %99, %103 : vector<2x256xf32>
    %c2_i32_43 = arith.constant 2 : i32
    %105 = vector.extract_strided_slice %104 {offsets = [0, 0], sizes = [2, 192], strides = [1, 1]} : vector<2x256xf32> to vector<2x192xf32>
    %106 = arith.negf %105 : vector<2x192xf32>
    %107 = math.exp %106 : vector<2x192xf32>
    %cst_44 = arith.constant 1.000000e+00 : f32
    %108 = vector.broadcast %cst_44 : f32 to vector<2x192xf32>
    %109 = arith.addf %108, %107 : vector<2x192xf32>
    %110 = arith.divf %108, %109 : vector<2x192xf32>
    %111 = vector.extract_strided_slice %110 {offsets = [0, 0], sizes = [2, 64], strides = [1, 1]} : vector<2x192xf32> to vector<2x64xf32>
    %112 = vector.extract_strided_slice %110 {offsets = [0, 64], sizes = [2, 64], strides = [1, 1]} : vector<2x192xf32> to vector<2x64xf32>
    %113 = vector.extract_strided_slice %110 {offsets = [0, 128], sizes = [2, 64], strides = [1, 1]} : vector<2x192xf32> to vector<2x64xf32>
    %114 = vector.extract_strided_slice %104 {offsets = [0, 192], sizes = [2, 64], strides = [1, 1]} : vector<2x256xf32> to vector<2x64xf32>
    %115 = math.tanh %114 : vector<2x64xf32>
    %116 = arith.mulf %112, %92 : vector<2x64xf32>
    %117 = arith.mulf %111, %115 : vector<2x64xf32>
    %118 = arith.addf %116, %117 : vector<2x64xf32>
    %119 = math.tanh %118 : vector<2x64xf32>
    %120 = arith.mulf %113, %119 : vector<2x64xf32>
    %121 = arith.index_cast %c2_i32_43 : i32 to index
    %c0_45 = arith.constant 0 : index
    %c0_46 = arith.constant 0 : index
    %122 = vector.load %arg8[%121, %c0_45, %c0_46] : memref<8x2x64xf32, #tpu.memory_space<vmem>>, vector<1x2x64xf32>
    %123 = vector.shape_cast %122 : vector<1x2x64xf32> to vector<2x64xf32>
    %124 = vector.shape_cast %120 : vector<2x64xf32> to vector<1x2x64xf32>
    tpu.vector_store %arg8[%121, %c0_45, %c0_46], %124 {strides = array<i32>} : memref<8x2x64xf32, #tpu.memory_space<vmem>>, vector<1x2x64xf32>,
    %cst_47 = arith.constant dense<0.000000e+00> : vector<2x256xf32>
    %125 = tpu.matmul %120, %0, %cst_47 {dimension_numbers = #tpu.dot_dimension_numbers<[1], [0], [0], [1], [0, 0, 1, 1], [], []>} : vector<2x64xf32>, vector<64x256xf32>, vector<2x256xf32> -> vector<2x256xf32>
    %c2_i32_48 = arith.constant 2 : i32
    %126 = arith.addi %c2_i32_43, %c2_i32_48 : i32
    %127 = arith.index_cast %126 : i32 to index
    %c0_49 = arith.constant 0 : index
    %c0_50 = arith.constant 0 : index
    %128 = vector.load %arg7[%127, %c0_49, %c0_50] : memref<9x2x256xf32, #tpu.memory_space<vmem>>, vector<1x2x256xf32>
    %129 = vector.shape_cast %128 : vector<1x2x256xf32> to vector<2x256xf32>
    %130 = arith.addf %125, %129 : vector<2x256xf32>
    %c3_i32 = arith.constant 3 : i32
    %131 = vector.extract_strided_slice %130 {offsets = [0, 0], sizes = [2, 192], strides = [1, 1]} : vector<2x256xf32> to vector<2x192xf32>
    %132 = arith.negf %131 : vector<2x192xf32>
    %133 = math.exp %132 : vector<2x192xf32>
    %cst_51 = arith.constant 1.000000e+00 : f32
    %134 = vector.broadcast %cst_51 : f32 to vector<2x192xf32>
    %135 = arith.addf %134, %133 : vector<2x192xf32>
    %136 = arith.divf %134, %135 : vector<2x192xf32>
    %137 = vector.extract_strided_slice %136 {offsets = [0, 0], sizes = [2, 64], strides = [1, 1]} : vector<2x192xf32> to vector<2x64xf32>
    %138 = vector.extract_strided_slice %136 {offsets = [0, 64], sizes = [2, 64], strides = [1, 1]} : vector<2x192xf32> to vector<2x64xf32>
    %139 = vector.extract_strided_slice %136 {offsets = [0, 128], sizes = [2, 64], strides = [1, 1]} : vector<2x192xf32> to vector<2x64xf32>
    %140 = vector.extract_strided_slice %130 {offsets = [0, 192], sizes = [2, 64], strides = [1, 1]} : vector<2x256xf32> to vector<2x64xf32>
    %141 = math.tanh %140 : vector<2x64xf32>
    %142 = arith.mulf %138, %118 : vector<2x64xf32>
    %143 = arith.mulf %137, %141 : vector<2x64xf32>
    %144 = arith.addf %142, %143 : vector<2x64xf32>
    %145 = math.tanh %144 : vector<2x64xf32>
    %146 = arith.mulf %139, %145 : vector<2x64xf32>
    %147 = arith.index_cast %c3_i32 : i32 to index
    %c0_52 = arith.constant 0 : index
    %c0_53 = arith.constant 0 : index
    %148 = vector.load %arg8[%147, %c0_52, %c0_53] : memref<8x2x64xf32, #tpu.memory_space<vmem>>, vector<1x2x64xf32>
    %149 = vector.shape_cast %148 : vector<1x2x64xf32> to vector<2x64xf32>
    %150 = vector.shape_cast %146 : vector<2x64xf32> to vector<1x2x64xf32>
    tpu.vector_store %arg8[%147, %c0_52, %c0_53], %150 {strides = array<i32>} : memref<8x2x64xf32, #tpu.memory_space<vmem>>, vector<1x2x64xf32>,
    %cst_54 = arith.constant dense<0.000000e+00> : vector<2x256xf32>
    %151 = tpu.matmul %146, %0, %cst_54 {dimension_numbers = #tpu.dot_dimension_numbers<[1], [0], [0], [1], [0, 0, 1, 1], [], []>} : vector<2x64xf32>, vector<64x256xf32>, vector<2x256xf32> -> vector<2x256xf32>
    %c2_i32_55 = arith.constant 2 : i32
    %152 = arith.addi %c3_i32, %c2_i32_55 : i32
    %153 = arith.index_cast %152 : i32 to index
    %c0_56 = arith.constant 0 : index
    %c0_57 = arith.constant 0 : index
    %154 = vector.load %arg7[%153, %c0_56, %c0_57] : memref<9x2x256xf32, #tpu.memory_space<vmem>>, vector<1x2x256xf32>
    %155 = vector.shape_cast %154 : vector<1x2x256xf32> to vector<2x256xf32>
    %156 = arith.addf %151, %155 : vector<2x256xf32>
    %c4_i32 = arith.constant 4 : i32
    %157 = vector.extract_strided_slice %156 {offsets = [0, 0], sizes = [2, 192], strides = [1, 1]} : vector<2x256xf32> to vector<2x192xf32>
    %158 = arith.negf %157 : vector<2x192xf32>
    %159 = math.exp %158 : vector<2x192xf32>
    %cst_58 = arith.constant 1.000000e+00 : f32
    %160 = vector.broadcast %cst_58 : f32 to vector<2x192xf32>
    %161 = arith.addf %160, %159 : vector<2x192xf32>
    %162 = arith.divf %160, %161 : vector<2x192xf32>
    %163 = vector.extract_strided_slice %162 {offsets = [0, 0], sizes = [2, 64], strides = [1, 1]} : vector<2x192xf32> to vector<2x64xf32>
    %164 = vector.extract_strided_slice %162 {offsets = [0, 64], sizes = [2, 64], strides = [1, 1]} : vector<2x192xf32> to vector<2x64xf32>
    %165 = vector.extract_strided_slice %162 {offsets = [0, 128], sizes = [2, 64], strides = [1, 1]} : vector<2x192xf32> to vector<2x64xf32>
    %166 = vector.extract_strided_slice %156 {offsets = [0, 192], sizes = [2, 64], strides = [1, 1]} : vector<2x256xf32> to vector<2x64xf32>
    %167 = math.tanh %166 : vector<2x64xf32>
    %168 = arith.mulf %164, %144 : vector<2x64xf32>
    %169 = arith.mulf %163, %167 : vector<2x64xf32>
    %170 = arith.addf %168, %169 : vector<2x64xf32>
    %171 = math.tanh %170 : vector<2x64xf32>
    %172 = arith.mulf %165, %171 : vector<2x64xf32>
    %173 = arith.index_cast %c4_i32 : i32 to index
    %c0_59 = arith.constant 0 : index
    %c0_60 = arith.constant 0 : index
    %174 = vector.load %arg8[%173, %c0_59, %c0_60] : memref<8x2x64xf32, #tpu.memory_space<vmem>>, vector<1x2x64xf32>
    %175 = vector.shape_cast %174 : vector<1x2x64xf32> to vector<2x64xf32>
    %176 = vector.shape_cast %172 : vector<2x64xf32> to vector<1x2x64xf32>
    tpu.vector_store %arg8[%173, %c0_59, %c0_60], %176 {strides = array<i32>} : memref<8x2x64xf32, #tpu.memory_space<vmem>>, vector<1x2x64xf32>,
    %cst_61 = arith.constant dense<0.000000e+00> : vector<2x256xf32>
    %177 = tpu.matmul %172, %0, %cst_61 {dimension_numbers = #tpu.dot_dimension_numbers<[1], [0], [0], [1], [0, 0, 1, 1], [], []>} : vector<2x64xf32>, vector<64x256xf32>, vector<2x256xf32> -> vector<2x256xf32>
    %c2_i32_62 = arith.constant 2 : i32
    %178 = arith.addi %c4_i32, %c2_i32_62 : i32
    %179 = arith.index_cast %178 : i32 to index
    %c0_63 = arith.constant 0 : index
    %c0_64 = arith.constant 0 : index
    %180 = vector.load %arg7[%179, %c0_63, %c0_64] : memref<9x2x256xf32, #tpu.memory_space<vmem>>, vector<1x2x256xf32>
    %181 = vector.shape_cast %180 : vector<1x2x256xf32> to vector<2x256xf32>
    %182 = arith.addf %177, %181 : vector<2x256xf32>
    %c5_i32 = arith.constant 5 : i32
    %183 = vector.extract_strided_slice %182 {offsets = [0, 0], sizes = [2, 192], strides = [1, 1]} : vector<2x256xf32> to vector<2x192xf32>
    %184 = arith.negf %183 : vector<2x192xf32>
    %185 = math.exp %184 : vector<2x192xf32>
    %cst_65 = arith.constant 1.000000e+00 : f32
    %186 = vector.broadcast %cst_65 : f32 to vector<2x192xf32>
    %187 = arith.addf %186, %185 : vector<2x192xf32>
    %188 = arith.divf %186, %187 : vector<2x192xf32>
    %189 = vector.extract_strided_slice %188 {offsets = [0, 0], sizes = [2, 64], strides = [1, 1]} : vector<2x192xf32> to vector<2x64xf32>
    %190 = vector.extract_strided_slice %188 {offsets = [0, 64], sizes = [2, 64], strides = [1, 1]} : vector<2x192xf32> to vector<2x64xf32>
    %191 = vector.extract_strided_slice %188 {offsets = [0, 128], sizes = [2, 64], strides = [1, 1]} : vector<2x192xf32> to vector<2x64xf32>
    %192 = vector.extract_strided_slice %182 {offsets = [0, 192], sizes = [2, 64], strides = [1, 1]} : vector<2x256xf32> to vector<2x64xf32>
    %193 = math.tanh %192 : vector<2x64xf32>
    %194 = arith.mulf %190, %170 : vector<2x64xf32>
    %195 = arith.mulf %189, %193 : vector<2x64xf32>
    %196 = arith.addf %194, %195 : vector<2x64xf32>
    %197 = math.tanh %196 : vector<2x64xf32>
    %198 = arith.mulf %191, %197 : vector<2x64xf32>
    %199 = arith.index_cast %c5_i32 : i32 to index
    %c0_66 = arith.constant 0 : index
    %c0_67 = arith.constant 0 : index
    %200 = vector.load %arg8[%199, %c0_66, %c0_67] : memref<8x2x64xf32, #tpu.memory_space<vmem>>, vector<1x2x64xf32>
    %201 = vector.shape_cast %200 : vector<1x2x64xf32> to vector<2x64xf32>
    %202 = vector.shape_cast %198 : vector<2x64xf32> to vector<1x2x64xf32>
    tpu.vector_store %arg8[%199, %c0_66, %c0_67], %202 {strides = array<i32>} : memref<8x2x64xf32, #tpu.memory_space<vmem>>, vector<1x2x64xf32>,
    %cst_68 = arith.constant dense<0.000000e+00> : vector<2x256xf32>
    %203 = tpu.matmul %198, %0, %cst_68 {dimension_numbers = #tpu.dot_dimension_numbers<[1], [0], [0], [1], [0, 0, 1, 1], [], []>} : vector<2x64xf32>, vector<64x256xf32>, vector<2x256xf32> -> vector<2x256xf32>
    %c2_i32_69 = arith.constant 2 : i32
    %204 = arith.addi %c5_i32, %c2_i32_69 : i32
    %205 = arith.index_cast %204 : i32 to index
    %c0_70 = arith.constant 0 : index
    %c0_71 = arith.constant 0 : index
    %206 = vector.load %arg7[%205, %c0_70, %c0_71] : memref<9x2x256xf32, #tpu.memory_space<vmem>>, vector<1x2x256xf32>
    %207 = vector.shape_cast %206 : vector<1x2x256xf32> to vector<2x256xf32>
    %208 = arith.addf %203, %207 : vector<2x256xf32>
    %c6_i32 = arith.constant 6 : i32
    %209 = vector.extract_strided_slice %208 {offsets = [0, 0], sizes = [2, 192], strides = [1, 1]} : vector<2x256xf32> to vector<2x192xf32>
    %210 = arith.negf %209 : vector<2x192xf32>
    %211 = math.exp %210 : vector<2x192xf32>
    %cst_72 = arith.constant 1.000000e+00 : f32
    %212 = vector.broadcast %cst_72 : f32 to vector<2x192xf32>
    %213 = arith.addf %212, %211 : vector<2x192xf32>
    %214 = arith.divf %212, %213 : vector<2x192xf32>
    %215 = vector.extract_strided_slice %214 {offsets = [0, 0], sizes = [2, 64], strides = [1, 1]} : vector<2x192xf32> to vector<2x64xf32>
    %216 = vector.extract_strided_slice %214 {offsets = [0, 64], sizes = [2, 64], strides = [1, 1]} : vector<2x192xf32> to vector<2x64xf32>
    %217 = vector.extract_strided_slice %214 {offsets = [0, 128], sizes = [2, 64], strides = [1, 1]} : vector<2x192xf32> to vector<2x64xf32>
    %218 = vector.extract_strided_slice %208 {offsets = [0, 192], sizes = [2, 64], strides = [1, 1]} : vector<2x256xf32> to vector<2x64xf32>
    %219 = math.tanh %218 : vector<2x64xf32>
    %220 = arith.mulf %216, %196 : vector<2x64xf32>
    %221 = arith.mulf %215, %219 : vector<2x64xf32>
    %222 = arith.addf %220, %221 : vector<2x64xf32>
    %223 = math.tanh %222 : vector<2x64xf32>
    %224 = arith.mulf %217, %223 : vector<2x64xf32>
    %225 = arith.index_cast %c6_i32 : i32 to index
    %c0_73 = arith.constant 0 : index
    %c0_74 = arith.constant 0 : index
    %226 = vector.load %arg8[%225, %c0_73, %c0_74] : memref<8x2x64xf32, #tpu.memory_space<vmem>>, vector<1x2x64xf32>
    %227 = vector.shape_cast %226 : vector<1x2x64xf32> to vector<2x64xf32>
    %228 = vector.shape_cast %224 : vector<2x64xf32> to vector<1x2x64xf32>
    tpu.vector_store %arg8[%225, %c0_73, %c0_74], %228 {strides = array<i32>} : memref<8x2x64xf32, #tpu.memory_space<vmem>>, vector<1x2x64xf32>,
    %cst_75 = arith.constant dense<0.000000e+00> : vector<2x256xf32>
    %229 = tpu.matmul %224, %0, %cst_75 {dimension_numbers = #tpu.dot_dimension_numbers<[1], [0], [0], [1], [0, 0, 1, 1], [], []>} : vector<2x64xf32>, vector<64x256xf32>, vector<2x256xf32> -> vector<2x256xf32>
    %c2_i32_76 = arith.constant 2 : i32
    %230 = arith.addi %c6_i32, %c2_i32_76 : i32
    %231 = arith.index_cast %230 : i32 to index
    %c0_77 = arith.constant 0 : index
    %c0_78 = arith.constant 0 : index
    %232 = vector.load %arg7[%231, %c0_77, %c0_78] : memref<9x2x256xf32, #tpu.memory_space<vmem>>, vector<1x2x256xf32>
    %233 = vector.shape_cast %232 : vector<1x2x256xf32> to vector<2x256xf32>
    %234 = arith.addf %229, %233 : vector<2x256xf32>
    %c7_i32 = arith.constant 7 : i32
    %235 = vector.extract_strided_slice %234 {offsets = [0, 0], sizes = [2, 192], strides = [1, 1]} : vector<2x256xf32> to vector<2x192xf32>
    %236 = arith.negf %235 : vector<2x192xf32>
    %237 = math.exp %236 : vector<2x192xf32>
    %cst_79 = arith.constant 1.000000e+00 : f32
    %238 = vector.broadcast %cst_79 : f32 to vector<2x192xf32>
    %239 = arith.addf %238, %237 : vector<2x192xf32>
    %240 = arith.divf %238, %239 : vector<2x192xf32>
    %241 = vector.extract_strided_slice %240 {offsets = [0, 0], sizes = [2, 64], strides = [1, 1]} : vector<2x192xf32> to vector<2x64xf32>
    %242 = vector.extract_strided_slice %240 {offsets = [0, 64], sizes = [2, 64], strides = [1, 1]} : vector<2x192xf32> to vector<2x64xf32>
    %243 = vector.extract_strided_slice %240 {offsets = [0, 128], sizes = [2, 64], strides = [1, 1]} : vector<2x192xf32> to vector<2x64xf32>
    %244 = vector.extract_strided_slice %234 {offsets = [0, 192], sizes = [2, 64], strides = [1, 1]} : vector<2x256xf32> to vector<2x64xf32>
    %245 = math.tanh %244 : vector<2x64xf32>
    %246 = arith.mulf %242, %222 : vector<2x64xf32>
    %247 = arith.mulf %241, %245 : vector<2x64xf32>
    %248 = arith.addf %246, %247 : vector<2x64xf32>
    %249 = math.tanh %248 : vector<2x64xf32>
    %250 = arith.mulf %243, %249 : vector<2x64xf32>
    %c7 = arith.constant 7 : index
    %c0_80 = arith.constant 0 : index
    %c0_81 = arith.constant 0 : index
    %251 = vector.load %arg8[%c7, %c0_80, %c0_81] : memref<8x2x64xf32, #tpu.memory_space<vmem>>, vector<1x2x64xf32>
    %252 = vector.shape_cast %251 : vector<1x2x64xf32> to vector<2x64xf32>
    %253 = vector.shape_cast %250 : vector<2x64xf32> to vector<1x2x64xf32>
    tpu.vector_store %arg8[%c7, %c0_80, %c0_81], %253 {strides = array<i32>} : memref<8x2x64xf32, #tpu.memory_space<vmem>>, vector<1x2x64xf32>,
    %254 = vector.extract_strided_slice %224 {offsets = [0, 0], sizes = [2, 32], strides = [1, 1]} : vector<2x64xf32> to vector<2x32xf32>
    %c0_82 = arith.constant 0 : index
    %c0_83 = arith.constant 0 : index
    %c0_84 = arith.constant 0 : index
    %255 = vector.load %arg5[%c0_82, %c0_83, %c0_84] : memref<2x2x32xf32, #tpu.memory_space<vmem>>, vector<1x2x32xf32>
    %256 = vector.shape_cast %255 : vector<1x2x32xf32> to vector<2x32xf32>
    %257 = vector.shape_cast %254 : vector<2x32xf32> to vector<1x2x32xf32>
    tpu.vector_store %arg5[%c0_82, %c0_83, %c0_84], %257 {strides = array<i32>} : memref<2x2x32xf32, #tpu.memory_space<vmem>>, vector<1x2x32xf32>,
    %258 = vector.extract_strided_slice %222 {offsets = [0, 0], sizes = [2, 32], strides = [1, 1]} : vector<2x64xf32> to vector<2x32xf32>
    %c0_85 = arith.constant 0 : index
    %c0_86 = arith.constant 0 : index
    %c0_87 = arith.constant 0 : index
    %259 = vector.load %arg6[%c0_85, %c0_86, %c0_87] : memref<2x2x32xf32, #tpu.memory_space<vmem>>, vector<1x2x32xf32>
    %260 = vector.shape_cast %259 : vector<1x2x32xf32> to vector<2x32xf32>
    %261 = vector.shape_cast %258 : vector<2x32xf32> to vector<1x2x32xf32>
    tpu.vector_store %arg6[%c0_85, %c0_86, %c0_87], %261 {strides = array<i32>} : memref<2x2x32xf32, #tpu.memory_space<vmem>>, vector<1x2x32xf32>,
    %262 = vector.extract_strided_slice %250 {offsets = [0, 32], sizes = [2, 32], strides = [1, 1]} : vector<2x64xf32> to vector<2x32xf32>
    %c1_88 = arith.constant 1 : index
    %c0_89 = arith.constant 0 : index
    %c0_90 = arith.constant 0 : index
    %263 = vector.load %arg5[%c1_88, %c0_89, %c0_90] : memref<2x2x32xf32, #tpu.memory_space<vmem>>, vector<1x2x32xf32>
    %264 = vector.shape_cast %263 : vector<1x2x32xf32> to vector<2x32xf32>
    %265 = vector.shape_cast %262 : vector<2x32xf32> to vector<1x2x32xf32>
    tpu.vector_store %arg5[%c1_88, %c0_89, %c0_90], %265 {strides = array<i32>} : memref<2x2x32xf32, #tpu.memory_space<vmem>>, vector<1x2x32xf32>,
    %266 = vector.extract_strided_slice %248 {offsets = [0, 32], sizes = [2, 32], strides = [1, 1]} : vector<2x64xf32> to vector<2x32xf32>
    %c1_91 = arith.constant 1 : index
    %c0_92 = arith.constant 0 : index
    %c0_93 = arith.constant 0 : index
    %267 = vector.load %arg6[%c1_91, %c0_92, %c0_93] : memref<2x2x32xf32, #tpu.memory_space<vmem>>, vector<1x2x32xf32>
    %268 = vector.shape_cast %267 : vector<1x2x32xf32> to vector<2x32xf32>
    %269 = vector.shape_cast %266 : vector<2x32xf32> to vector<1x2x32xf32>
    tpu.vector_store %arg6[%c1_91, %c0_92, %c0_93], %269 {strides = array<i32>} : memref<2x2x32xf32, #tpu.memory_space<vmem>>, vector<1x2x32xf32>,
    %c0_94 = arith.constant 0 : index
    %c0_95 = arith.constant 0 : index
    %c0_96 = arith.constant 0 : index
    %270 = vector.load %arg8[%c0_94, %c0_95, %c0_96] : memref<8x2x64xf32, #tpu.memory_space<vmem>>, vector<8x2x64xf32>
    %271 = vector.shape_cast %3 : vector<1x64xf32> to vector<1x1x64xf32>
    %272 = vector.broadcast %271 : vector<1x1x64xf32> to vector<8x2x64xf32>
    %273 = arith.mulf %270, %272 : vector<8x2x64xf32>
    %cst_97 = arith.constant dense<0.000000e+00> : vector<8x2xf32>
    %274 = vector.multi_reduction <add>, %273, %cst_97 [2] : vector<8x2x64xf32> to vector<8x2xf32>
    %275 = vector.broadcast %4 : vector<1x1xf32> to vector<8x2xf32>
    %276 = arith.addf %274, %275 : vector<8x2xf32>
    %c0_98 = arith.constant 0 : index
    %c0_99 = arith.constant 0 : index
    %277 = vector.load %arg4[%c0_98, %c0_99] : memref<8x2xf32, #tpu.memory_space<vmem>>, vector<8x2xf32>
    tpu.vector_store %arg4[%c0_98, %c0_99], %276 {strides = array<i32>} : memref<8x2xf32, #tpu.memory_space<vmem>>, vector<8x2xf32>,
    return
  }
}

</mosaic_0001>

<bundles_post_ra>
// kernel: lstm_demo_forward.1
= control target key start
LH: loop header
LB: loop body
LE: loop exit
PB: predicated region body
PF: predicated region fallthrough
CT: control target
= control target key end

     0   :  { %12 = vsyncpa [#allocation5], 0  ;;  %s1891_s27 = smov 32   ;;  %v1892_v11 = vmov 0.0   ;;  %v1893_v12 = vmov 0   ;;  %s2292_s0 = inlined_call_operand.vmem [shape: f32[9,2,1], index: 0, kind: input, shape index: {}]   ;;  %s2293_s1 = inlined_call_operand.vmem [shape: f32[2,2,32], index: 1, kind: input, shape index: {}]   ;;  %s2294_s2 = inlined_call_operand.vmem [shape: f32[2,2,32], index: 2, kind: input, shape index: {}]   ;;  %s2295_s3 = inlined_call_operand.vmem [shape: f32[68,256], index: 3, kind: input, shape index: {}]   ;;  %s2296_s4 = inlined_call_operand.vmem [shape: f32[8,2], index: 4, kind: output, shape index: {0}]   ;;  %s2297_s5 = inlined_call_operand.hbm [shape: f32[2,2,32], index: 5, kind: output, shape index: {1}]   ;;  %s2298_s6 = inlined_call_operand.hbm [shape: f32[2,2,32], index: 6, kind: output, shape index: {2}]  }
   0x1   :  { %v1543_v0 = vld [vmem:[%s2293_s1 + $0x2] sm:$0x3]  ;;  %v23_v1 = vld [vmem:[%s2295_s3 + $0x8] sm:$0xff]  ;;  %v25_v2 = vld [vmem:[%s2295_s3 + $0x18] sm:$0xff]  ;;  %361 = vmatprep.mubr.f32.mxu0 %v1892_v11  ;;  %1733 = vset.pattern.permute.xlu0 %v1893_v12 }
   0x2   :  { %268 = vrot.lane.b32.xlu0 %v1543_v0, %s1891_s27  ;;  %v1944_v3 = vpack.c.bf16 %v25_v2, %v23_v1  ;;  %v22_v4 = vld [vmem:[%s2295_s3] sm:$0xff]  ;;  %v24_v5 = vld [vmem:[%s2295_s3 + $0x10] sm:$0xff]  ;;  %v27_v6 = vld [vmem:[%s2295_s3 + $0x28] sm:$0xff]  ;;  %491 = vmatprep.mubr.f32.mxu1 %v1892_v11 }
   0x3   :  { %v1955_v7 = vpack.c.bf16 %v24_v5, %v22_v4  ;;  %v29_v8 = vld [vmem:[%s2295_s3 + $0x38] sm:$0xff]  ;;  %v26_v9 = vld [vmem:[%s2295_s3 + $0x20] sm:$0xff]  ;;  %v28_v10 = vld [vmem:[%s2295_s3 + $0x30] sm:$0xff]  ;;  %1734 = vset.pattern.permute.xlu1 %v1893_v12 }
   0x4   :  { %1582 = vmatprep.subr.bf16.mxu0 %v1944_v3  ;;  %v1968_v13 = vpack.c.bf16 %v29_v8, %v27_v6  ;;  %v31_v14 = vld [vmem:[%s2295_s3 + $0x48] sm:$0xff]  ;;  %v33_v15 = vld [vmem:[%s2295_s3 + $0x58] sm:$0xff]  ;;  %1598 = vmatprep.subr.bf16.mxu1 %v1944_v3  ;;  %v1978_v16 = vpack.c.bf16 %v28_v10, %v26_v9  ;;  %v30_v17 = vld [vmem:[%s2295_s3 + $0x40] sm:$0xff] }
   0x5   :  { %1584 = vmatpush1.bf16.msra.mxu0 %v1955_v7  ;;  %1600 = vmatpush1.bf16.msra.mxu1 %v1955_v7  ;;  %v1985_v18 = vpack.c.bf16 %v33_v15, %v31_v14  ;;  %v32_v19 = vld [vmem:[%s2295_s3 + $0x50] sm:$0xff]  ;;  %v35_v20 = vld [vmem:[%s2295_s3 + $0x68] sm:$0xff]  ;;  %v37_v21 = vld [vmem:[%s2295_s3 + $0x78] sm:$0xff] }
   0x6   :  { %1586 = vmatprep.subr.bf16.mxu0 %v1968_v13  ;;  %1602 = vmatprep.subr.bf16.mxu1 %v1968_v13  ;;  %v44_v22 = vld [vmem:[%s2292_s0] sm:$0x3]  ;;  %v1544_v23 = vld [vmem:[%s2294_s2 + $0x2] sm:$0x3] }
   0x7   :  { %13 = vsyncpa [#allocation7], 0  ;;  %55 = vperm.xlu0 %1733, %v44_v22   ;;  %277 = vrot.lane.b32.xlu1 %v1544_v23, %s1891_s27  ;;  %v2006_v24 = vpack.c.bf16 %v32_v19, %v30_v17  ;;  %v2009_v25 = vpack.c.bf16 %v37_v21, %v35_v20  ;;  %v34_v26 = vld [vmem:[%s2295_s3 + $0x60] sm:$0xff]  ;;  %v36_v27 = vld [vmem:[%s2295_s3 + $0x70] sm:$0xff]  ;;  %vm271_vm0 = vcmask 261120   ;;  %vm293_vm1 = vcmask 523264  }
   0x8   :  { %v2020_v28 = vpack.c.bf16 %v36_v27, %v34_v26  ;;  %v264_v29 = vld [vmem:[%s2293_s1] sm:$0x3]  ;;  %v99_v32 = vlaneseq  ;;  %s1894_s20 = smov 64   ;;  %v45_v0 = vld [vmem:[%s2292_s0 + $0x2] sm:$0x3]  ;;  %vm532_vm3 = vcmask 517120  }
   0x9   :  { %1588 = vmatpush1.bf16.msra.mxu0 %v1978_v16  ;;  %1604 = vmatpush1.bf16.msra.mxu1 %v1978_v16  ;;  %v1532_v36 = vld [vmem:[%s2295_s3 + $0x80] ss:$8 sm:$0x3]  ;;  %v1533_v37 = vld [vmem:[%s2295_s3 + $0x81] ss:$8 sm:$0x3] }
   0xa   :  { %1590 = vmatprep.subr.bf16.mxu0 %v1985_v18  ;;  %1606 = vmatprep.subr.bf16.mxu1 %v1985_v18  ;;  %v2042_v33 = vshrl.u32 %v99_v32, 7  ;;  %v273_v54 = vld [vmem:[%s2294_s2] sm:$0x3]  ;;  %v2086_v21 = vand.u32 127, %v99_v32  ;;  %vm1367_vm4 = vcmask 254976   ;;  %s1895_s15 = smov 96  }
   0xc   :  { %v101_v34 = vsub.s32 0, %v2042_v33  ;;  %v105_v35 = vsub.s32 1, %v2042_v33  ;;  %vm404_vm2 = vcmp.lt.s32.totalorder %v2086_v21, 32 }
   0xd   :  { %1592 = vmatpush1.bf16.msra.mxu0 %v2006_v24  ;;  %1608 = vmatpush1.bf16.msra.mxu1 %v2006_v24 }
   0xe   :  { %1594 = vmatprep.subr.bf16.mxu0 %v2009_v25  ;;  %1610 = vmatprep.subr.bf16.mxu1 %v2009_v25  ;;  %v2056_v38 = vrot.slane %v1532_v36, %v101_v34  ;;  %v2058_v39 = vrot.slane %v1532_v36, %v105_v35  ;;  %v2061_v40 = vrot.slane %v1533_v37, %v101_v34 }
   0xf   :  { %v2063_v41 = vrot.slane %v1533_v37, %v105_v35 }
  0x11   :  { %1596 = vmatpush1.bf16.msra.mxu0 %v2020_v28  ;;  %1612 = vmatpush1.bf16.msra.mxu1 %v2020_v28 }
  0x12   :  { %1614 = vmatprep.subr.bf16.mxu0 %v1944_v3  ;;  %1630 = vmatprep.subr.bf16.mxu1 %v1944_v3 }
  0x74   :  { %v269_v30 = vpop.permute.xlu0 %268 }
  0x75   :  { %v2033_v31 = vsel %vm271_vm0, %v264_v29, %v269_v30 }
  0x76   :  { %1546 = vmatmul.mubr.msk.f32.vlgmr.msra.gmra.mrb[0].mxu0 %vm293_vm1, %v2033_v31 }
  0x77   :  { %1616 = vmatpush1.bf16.msra.mxu0 %v1955_v7  ;;  %614 = vmatprep.mubr.f32.mxu0 %v1892_v11 }
  0x78   :  { %1618 = vmatprep.subr.bf16.mxu0 %v1968_v13 }
  0x79   :  { %v278_v53 = vpop.permute.xlu1 %277 }
  0x7a   :  { %v280_v56 = vsel %vm271_vm0, %v273_v54, %v278_v53 }
  0x7b   :  { %1620 = vmatpush1.bf16.msra.mxu0 %v1978_v16 }
  0x7c   :  { %1622 = vmatprep.subr.bf16.mxu0 %v1985_v18 }
  0x7f   :  { %1624 = vmatpush1.bf16.msra.mxu0 %v2006_v24 }
  0x80   :  { %1626 = vmatprep.subr.bf16.mxu0 %v2009_v25 }
  0x83   :  { %1628 = vmatpush1.bf16.msra.mxu0 %v2020_v28 }
  0x84   :  { %1646 = vmatprep.subr.bf16.mxu0 %v1944_v3 }
  0x86   :  { %v56_v42 = vpop.permute.xlu0 %55 }
  0x87   :  { %v109_v43 = vmul.f32 %v2056_v38, %v56_v42  ;;  %v110_v44 = vmul.f32 %v2058_v39, %v56_v42 }
  0x89   :  { %v138_v45 = vadd.f32 %v2061_v40, %v109_v43  ;;  %v139_v46 = vadd.f32 %v2063_v41, %v110_v44 }
  0x8b   :  { %v174_v47 = vcombine.low %v138_v45, %v139_v46 }
  0x8d   :  { %1534 = vst.sshfl [vmem:[#allocation2] sm:$0x33 pattern:$0x76325410] %v174_v47 }
  0x94   :  { %v1545_v48 = vld.sshfl [vmem:[#allocation2] sm:$0x33 pattern:$0x76325410] }
  0x95   :  { %v290_v49 = vcombine.high %v1545_v48, %v1545_v48 }
 0x149   :  { %v363_v50 = vpop.f32.mrb[0].mxu0 }
 0x14a   :  { %v365_v51 = vpop.f32.mrb[1].mxu0  ;;  %v364_v57 = vadd.f32 %v1545_v48, %v363_v50 }
 0x14b   :  { %v366_v52 = vadd.f32 %v365_v51, %v290_v49  ;;  %v46_v49 = vld [vmem:[%s2292_s0 + $0x4] sm:$0x3] }
 0x14c   :  { %v1547_v58 = vmul.f32 -1.442695, %v364_v57 }
 0x14d   :  { %1735 = vtanh.f32 %v366_v52  ;;  %v1548_v17 = vmul.f32 -1.442695, %v366_v52 }
 0x14e   :  { %1737 = vpow2.f32 %v1547_v58 }
 0x157   :  { %v1736_v55 = vpop.eup %1735 }
 0x158   :  { %387 = vrot.lane.b32.xlu1 %v1736_v55, %s1894_s20  ;;  %v1738_v59 = vpop.eup %1737 }
 0x159   :  { %v374_v60 = vadd.f32 1.0, %v1738_v59 }
 0x15b   :  { %1739 = vrcp.f32 %v374_v60 }
 0x15c   :  { %382 = vrot.lane.b32.xlu1 %v280_v56, %s1894_s20 }
 0x165   :  { %v1740_v61 = vpop.eup %1739 }
 0x1ca   :  { %v388_v62 = vpop.permute.xlu1 %387 }
 0x1cb   :  { %v390_v63 = vmul.f32 %v1740_v61, %v388_v62 }
 0x1cd   :  { %392 = vrot.lane.b32.xlu0 %v390_v63, %s1894_s20 }
 0x1ce   :  { %v383_v1 = vpop.permute.xlu1 %382 }
 0x1cf   :  { %v385_v2 = vmul.f32 %v1740_v61, %v383_v1 }
 0x1d1   :  { %60 = vperm.xlu0 %1733, %v45_v0  }
 0x23f   :  { %v393_v4 = vpop.permute.xlu0 %392 }
 0x240   :  { %v395_v5 = vadd.f32 %v393_v4, %v385_v2 }
 0x242   :  { %1741 = vtanh.f32 %v395_v5 }
 0x243   :  { %1743 = vpow2.f32 %v1548_v17 }
 0x24c   :  { %v1742_v6 = vpop.eup %1741 }
 0x24d   :  { %398 = vrot.lane.b32.xlu1 %v1742_v6, %s1894_s20  ;;  %v1744_v19 = vpop.eup %1743 }
 0x24e   :  { %v375_v20 = vadd.f32 1.0, %v1744_v19 }
 0x250   :  { %v61_v8 = vpop.permute.xlu0 %60  ;;  %1745 = vrcp.f32 %v375_v20 }
 0x251   :  { %v111_v9 = vmul.f32 %v2056_v38, %v61_v8  ;;  %v112_v10 = vmul.f32 %v2058_v39, %v61_v8  ;;  %407 = vrot.lane.b32.xlu1 %v395_v5, %s1894_s20 }
 0x253   :  { %v140_v12 = vadd.f32 %v2061_v40, %v111_v9  ;;  %v141_v14 = vadd.f32 %v2063_v41, %v112_v10 }
 0x255   :  { %v182_v15 = vcombine.low %v140_v12, %v141_v14 }
 0x257   :  { %1535 = vst.sshfl [vmem:[#allocation2 + $0x4] sm:$0x33 pattern:$0x76325410] %v182_v15 }
 0x25a   :  { %v1746_v22 = vpop.eup %1745 }
 0x2bf   :  { %v399_v23 = vpop.permute.xlu1 %398 }
 0x2c0   :  { %v401_v26 = vmul.f32 %v1746_v22, %v399_v23  ;;  %v47_v23 = vld [vmem:[%s2292_s0 + $0x6] sm:$0x3] }
 0x2c2   :  { %v405_v27 = vsel %vm404_vm2, %v401_v26, %v2033_v31  ;;  %v1549_v31 = vld.sshfl [vmem:[#allocation2 + $0x4] sm:$0x33 pattern:$0x76325410] }
 0x2c3   :  { %1550 = vmatmul.mubr.msk.f32.vlgmr.msra.gmra.mrb[0].mxu1 %vm293_vm1, %v405_v27  ;;  %v408_v29 = vpop.permute.xlu1 %407  ;;  %v421_v34 = vcombine.high %v1549_v31, %v1549_v31 }
 0x2c4   :  { %v410_v30 = vsel %vm404_vm2, %v408_v29, %v280_v56  ;;  %1632 = vmatpush1.bf16.msra.mxu1 %v1955_v7  ;;  %733 = vmatprep.mubr.f32.mxu1 %v1892_v11 }
 0x2c5   :  { %512 = vrot.lane.b32.xlu1 %v410_v30, %s1894_s20  ;;  %1634 = vmatprep.subr.bf16.mxu1 %v1968_v13 }
 0x2c8   :  { %1636 = vmatpush1.bf16.msra.mxu1 %v1978_v16 }
 0x2c9   :  { %1638 = vmatprep.subr.bf16.mxu1 %v1985_v18 }
 0x2cc   :  { %1640 = vmatpush1.bf16.msra.mxu1 %v2006_v24 }
 0x2cd   :  { %1642 = vmatprep.subr.bf16.mxu1 %v2009_v25 }
 0x2d0   :  { %1644 = vmatpush1.bf16.msra.mxu1 %v2020_v28 }
 0x2d1   :  { %1662 = vmatprep.subr.bf16.mxu1 %v1944_v3 }
 0x337   :  { %v513_v50 = vpop.permute.xlu1 %512 }
 0x396   :  { %v493_v32 = vpop.f32.mrb[0].mxu1 }
 0x397   :  { %v495_v35 = vpop.f32.mrb[1].mxu1  ;;  %v494_v42 = vadd.f32 %v1549_v31, %v493_v32 }
 0x398   :  { %v496_v36 = vadd.f32 %v495_v35, %v421_v34 }
 0x399   :  { %v1551_v43 = vmul.f32 -1.442695, %v494_v42 }
 0x39a   :  { %1747 = vtanh.f32 %v496_v36  ;;  %v1552_v61 = vmul.f32 -1.442695, %v496_v36 }
 0x39b   :  { %1749 = vpow2.f32 %v1551_v43 }
 0x3a4   :  { %v1748_v37 = vpop.eup %1747 }
 0x3a5   :  { %517 = vrot.lane.b32.xlu0 %v1748_v37, %s1894_s20  ;;  %v1750_v44 = vpop.eup %1749 }
 0x3a6   :  { %v504_v45 = vadd.f32 1.0, %v1750_v44 }
 0x3a8   :  { %1751 = vrcp.f32 %v504_v45 }
 0x3b2   :  { %v1752_v46 = vpop.eup %1751 }
 0x3b3   :  { %v515_v51 = vmul.f32 %v1752_v46, %v513_v50 }
 0x417   :  { %v518_v47 = vpop.permute.xlu0 %517 }
 0x418   :  { %v520_v48 = vmul.f32 %v1752_v46, %v518_v47 }
 0x41a   :  { %522 = vrot.lane.b32.xlu0 %v520_v48, %s1894_s20 }
 0x41e   :  { %65 = vperm.xlu0 %1733, %v46_v49  }
 0x48c   :  { %v523_v52 = vpop.permute.xlu0 %522 }
 0x48d   :  { %v525_v53 = vadd.f32 %v523_v52, %v515_v51 }
 0x48f   :  { %1753 = vtanh.f32 %v525_v53 }
 0x490   :  { %1755 = vpow2.f32 %v1552_v61  ;;  %v48_v61 = vld [vmem:[%s2292_s0 + $0x8] sm:$0x3] }
 0x499   :  { %v1754_v54 = vpop.eup %1753 }
 0x49a   :  { %528 = vrot.lane.b32.xlu1 %v1754_v54, %s1894_s20  ;;  %v1756_v62 = vpop.eup %1755 }
 0x49b   :  { %v505_v63 = vadd.f32 1.0, %v1756_v62 }
 0x49d   :  { %v66_v55 = vpop.permute.xlu0 %65  ;;  %1757 = vrcp.f32 %v505_v63 }
 0x49e   :  { %v113_v56 = vmul.f32 %v2056_v38, %v66_v55  ;;  %v114_v57 = vmul.f32 %v2058_v39, %v66_v55 }
 0x4a0   :  { %v142_v58 = vadd.f32 %v2061_v40, %v113_v56  ;;  %v143_v59 = vadd.f32 %v2063_v41, %v114_v57 }
 0x4a2   :  { %v190_v60 = vcombine.low %v142_v58, %v143_v59 }
 0x4a4   :  { %1536 = vst.sshfl [vmem:[#allocation2 + $0x8] sm:$0x33 pattern:$0x76325410] %v190_v60 }
 0x4a7   :  { %v1758_v0 = vpop.eup %1757 }
 0x4ab   :  { %v1553_v4 = vld.sshfl [vmem:[#allocation2 + $0x8] sm:$0x33 pattern:$0x76325410] }
 0x4ac   :  { %v544_v6 = vcombine.high %v1553_v4, %v1553_v4 }
 0x50c   :  { %v529_v1 = vpop.permute.xlu1 %528 }
 0x50d   :  { %v531_v2 = vmul.f32 %v1758_v0, %v529_v1 }
 0x50f   :  { %533 = vst.msk [vmem:[#allocation3] sm:$0x3] %vm532_vm3, %v531_v2  ;;  %1554 = vmatmul.mubr.msk.f32.vlgmr.msra.gmra.mrb[2].mxu0 %vm293_vm1, %v531_v2 }
 0x510   :  { %1648 = vmatpush1.bf16.msra.mxu0 %v1955_v7  ;;  %852 = vmatprep.mubr.f32.mxu0 %v1892_v11 }
 0x511   :  { %1650 = vmatprep.subr.bf16.mxu0 %v1968_v13 }
 0x514   :  { %1652 = vmatpush1.bf16.msra.mxu0 %v1978_v16 }
 0x515   :  { %1654 = vmatprep.subr.bf16.mxu0 %v1985_v18 }
 0x518   :  { %1656 = vmatpush1.bf16.msra.mxu0 %v2006_v24 }
 0x519   :  { %1658 = vmatprep.subr.bf16.mxu0 %v2009_v25 }
 0x51c   :  { %1660 = vmatpush1.bf16.msra.mxu0 %v2020_v28 }
 0x51d   :  { %1678 = vmatprep.subr.bf16.mxu0 %v1944_v3 }
 0x5e2   :  { %v616_v5 = vpop.f32.mrb[2].mxu0 }
 0x5e3   :  { %v618_v8 = vpop.f32.mrb[3].mxu0  ;;  %v617_v12 = vadd.f32 %v1553_v4, %v616_v5 }
 0x5e4   :  { %v619_v9 = vadd.f32 %v618_v8, %v544_v6 }
 0x5e5   :  { %v1555_v14 = vmul.f32 -1.442695, %v617_v12 }
 0x5e6   :  { %1759 = vtanh.f32 %v619_v9  ;;  %v1556_v42 = vmul.f32 -1.442695, %v619_v9 }
 0x5e7   :  { %1761 = vpow2.f32 %v1555_v14 }
 0x5f0   :  { %v1760_v10 = vpop.eup %1759 }
 0x5f1   :  { %636 = vrot.lane.b32.xlu1 %v1760_v10, %s1894_s20  ;;  %v1762_v15 = vpop.eup %1761 }
 0x5f2   :  { %v627_v17 = vadd.f32 1.0, %v1762_v15 }
 0x5f4   :  { %1763 = vrcp.f32 %v627_v17 }
 0x5fe   :  { %v1764_v19 = vpop.eup %1763 }
 0x5ff   :  { %v634_v26 = vmul.f32 %v1764_v19, %v525_v53 }
 0x663   :  { %v637_v20 = vpop.permute.xlu1 %636 }
 0x664   :  { %v639_v22 = vmul.f32 %v1764_v19, %v637_v20 }
 0x666   :  { %641 = vrot.lane.b32.xlu0 %v639_v22, %s1894_s20 }
 0x66a   :  { %70 = vperm.xlu0 %1733, %v47_v23  }
 0x6d8   :  { %v642_v27 = vpop.permute.xlu0 %641 }
 0x6d9   :  { %v644_v29 = vadd.f32 %v642_v27, %v634_v26 }
 0x6db   :  { %1765 = vtanh.f32 %v644_v29 }
 0x6dc   :  { %1767 = vpow2.f32 %v1556_v42 }
 0x6e5   :  { %v1766_v30 = vpop.eup %1765 }
 0x6e6   :  { %647 = vrot.lane.b32.xlu1 %v1766_v30, %s1894_s20  ;;  %v1768_v43 = vpop.eup %1767 }
 0x6e7   :  { %v628_v44 = vadd.f32 1.0, %v1768_v43 }
 0x6e9   :  { %v71_v31 = vpop.permute.xlu0 %70  ;;  %1769 = vrcp.f32 %v628_v44 }
 0x6ea   :  { %v115_v32 = vmul.f32 %v2056_v38, %v71_v31  ;;  %v116_v34 = vmul.f32 %v2058_v39, %v71_v31 }
 0x6ec   :  { %v144_v35 = vadd.f32 %v2061_v40, %v115_v32  ;;  %v145_v36 = vadd.f32 %v2063_v41, %v116_v34 }
 0x6ee   :  { %v198_v37 = vcombine.low %v144_v35, %v145_v36 }
 0x6f0   :  { %1537 = vst.sshfl [vmem:[#allocation2 + $0xc] sm:$0x33 pattern:$0x76325410] %v198_v37 }
 0x6f3   :  { %v1770_v45 = vpop.eup %1769 }
 0x6f7   :  { %v1557_v48 = vld.sshfl [vmem:[#allocation2 + $0xc] sm:$0x33 pattern:$0x76325410] }
 0x6f8   :  { %v663_v50 = vcombine.high %v1557_v48, %v1557_v48 }
 0x758   :  { %v648_v46 = vpop.permute.xlu1 %647 }
 0x759   :  { %v650_v47 = vmul.f32 %v1770_v45, %v648_v46 }
 0x75b   :  { %652 = vst.msk [vmem:[#allocation3 + $0x2] sm:$0x3] %vm532_vm3, %v650_v47  ;;  %1558 = vmatmul.mubr.msk.f32.vlgmr.msra.gmra.mrb[2].mxu1 %vm293_vm1, %v650_v47 }
 0x75c   :  { %1664 = vmatpush1.bf16.msra.mxu1 %v1955_v7  ;;  %971 = vmatprep.mubr.f32.mxu1 %v1892_v11 }
 0x75d   :  { %1666 = vmatprep.subr.bf16.mxu1 %v1968_v13 }
 0x760   :  { %1668 = vmatpush1.bf16.msra.mxu1 %v1978_v16 }
 0x761   :  { %1670 = vmatprep.subr.bf16.mxu1 %v1985_v18 }
 0x764   :  { %1672 = vmatpush1.bf16.msra.mxu1 %v2006_v24 }
 0x765   :  { %1674 = vmatprep.subr.bf16.mxu1 %v2009_v25 }
 0x768   :  { %1676 = vmatpush1.bf16.msra.mxu1 %v2020_v28 }
 0x769   :  { %1694 = vmatprep.subr.bf16.mxu1 %v1944_v3 }
 0x82e   :  { %v735_v49 = vpop.f32.mrb[2].mxu1 }
 0x82f   :  { %v737_v51 = vpop.f32.mrb[3].mxu1  ;;  %v736_v54 = vadd.f32 %v1557_v48, %v735_v49 }
 0x830   :  { %v738_v52 = vadd.f32 %v737_v51, %v663_v50 }
 0x831   :  { %v1559_v55 = vmul.f32 -1.442695, %v736_v54 }
 0x832   :  { %1771 = vtanh.f32 %v738_v52  ;;  %v1560_v10 = vmul.f32 -1.442695, %v738_v52 }
 0x833   :  { %1773 = vpow2.f32 %v1559_v55 }
 0x83c   :  { %v1772_v53 = vpop.eup %1771 }
 0x83d   :  { %755 = vrot.lane.b32.xlu1 %v1772_v53, %s1894_s20  ;;  %v1774_v56 = vpop.eup %1773 }
 0x83e   :  { %v746_v57 = vadd.f32 1.0, %v1774_v56 }
 0x840   :  { %1775 = vrcp.f32 %v746_v57 }
 0x84a   :  { %v1776_v58 = vpop.eup %1775 }
 0x84b   :  { %v753_v62 = vmul.f32 %v1776_v58, %v644_v29 }
 0x8af   :  { %v756_v59 = vpop.permute.xlu1 %755 }
 0x8b0   :  { %v758_v60 = vmul.f32 %v1776_v58, %v756_v59 }
 0x8b2   :  { %760 = vrot.lane.b32.xlu0 %v758_v60, %s1894_s20 }
 0x8b6   :  { %75 = vperm.xlu0 %1733, %v48_v61  }
 0x924   :  { %v761_v63 = vpop.permute.xlu0 %760 }
 0x925   :  { %v763_v0 = vadd.f32 %v761_v63, %v753_v62 }
 0x927   :  { %1777 = vtanh.f32 %v763_v0 }
 0x928   :  { %1779 = vpow2.f32 %v1560_v10 }
 0x931   :  { %v1778_v1 = vpop.eup %1777 }
 0x932   :  { %766 = vrot.lane.b32.xlu1 %v1778_v1, %s1894_s20  ;;  %v1780_v12 = vpop.eup %1779 }
 0x933   :  { %v747_v14 = vadd.f32 1.0, %v1780_v12 }
 0x935   :  { %v76_v2 = vpop.permute.xlu0 %75  ;;  %1781 = vrcp.f32 %v747_v14 }
 0x936   :  { %v117_v4 = vmul.f32 %v2056_v38, %v76_v2  ;;  %v118_v5 = vmul.f32 %v2058_v39, %v76_v2 }
 0x938   :  { %v146_v6 = vadd.f32 %v2061_v40, %v117_v4  ;;  %v147_v8 = vadd.f32 %v2063_v41, %v118_v5 }
 0x93a   :  { %v206_v9 = vcombine.low %v146_v6, %v147_v8 }
 0x93c   :  { %1538 = vst.sshfl [vmem:[#allocation2 + $0x10] sm:$0x33 pattern:$0x76325410] %v206_v9  ;;  %v50_v9 = vld [vmem:[%s2292_s0 + $0xc] sm:$0x3] }
 0x93f   :  { %v1782_v15 = vpop.eup %1781 }
 0x943   :  { %v1561_v20 = vld.sshfl [vmem:[#allocation2 + $0x10] sm:$0x33 pattern:$0x76325410] }
 0x944   :  { %v782_v23 = vcombine.high %v1561_v20, %v1561_v20 }
 0x9a4   :  { %v767_v17 = vpop.permute.xlu1 %766 }
 0x9a5   :  { %v769_v19 = vmul.f32 %v1782_v15, %v767_v17 }
 0x9a7   :  { %771 = vst.msk [vmem:[#allocation3 + $0x4] sm:$0x3] %vm532_vm3, %v769_v19  ;;  %1562 = vmatmul.mubr.msk.f32.vlgmr.msra.gmra.mrb[4].mxu0 %vm293_vm1, %v769_v19 }
 0x9a8   :  { %1680 = vmatpush1.bf16.msra.mxu0 %v1955_v7  ;;  %1090 = vmatprep.mubr.f32.mxu0 %v1892_v11 }
 0x9a9   :  { %1682 = vmatprep.subr.bf16.mxu0 %v1968_v13 }
 0x9ac   :  { %1684 = vmatpush1.bf16.msra.mxu0 %v1978_v16 }
 0x9ad   :  { %1686 = vmatprep.subr.bf16.mxu0 %v1985_v18 }
 0x9b0   :  { %1688 = vmatpush1.bf16.msra.mxu0 %v2006_v24 }
 0x9b1   :  { %1690 = vmatprep.subr.bf16.mxu0 %v2009_v25 }
 0x9b4   :  { %1692 = vmatpush1.bf16.msra.mxu0 %v2020_v28 }
 0x9b5   :  { %1710 = vmatprep.subr.bf16.mxu0 %v1944_v3  ;;  %v49_v3 = vld [vmem:[%s2292_s0 + $0xa] sm:$0x3] }
 0xa7a   :  { %v854_v22 = vpop.f32.mrb[4].mxu0 }
 0xa7b   :  { %v856_v26 = vpop.f32.mrb[5].mxu0  ;;  %v855_v30 = vadd.f32 %v1561_v20, %v854_v22 }
 0xa7c   :  { %v857_v27 = vadd.f32 %v856_v26, %v782_v23 }
 0xa7d   :  { %v1563_v31 = vmul.f32 -1.442695, %v855_v30 }
 0xa7e   :  { %1783 = vtanh.f32 %v857_v27  ;;  %v1564_v52 = vmul.f32 -1.442695, %v857_v27 }
 0xa7f   :  { %1785 = vpow2.f32 %v1563_v31 }
 0xa88   :  { %v1784_v29 = vpop.eup %1783 }
 0xa89   :  { %874 = vrot.lane.b32.xlu1 %v1784_v29, %s1894_s20  ;;  %v1786_v32 = vpop.eup %1785 }
 0xa8a   :  { %v865_v34 = vadd.f32 1.0, %v1786_v32 }
 0xa8c   :  { %1787 = vrcp.f32 %v865_v34 }
 0xa96   :  { %v1788_v35 = vpop.eup %1787 }
 0xa97   :  { %v872_v42 = vmul.f32 %v1788_v35, %v763_v0 }
 0xafb   :  { %v875_v36 = vpop.permute.xlu1 %874 }
 0xafc   :  { %v877_v37 = vmul.f32 %v1788_v35, %v875_v36 }
 0xafe   :  { %879 = vrot.lane.b32.xlu0 %v877_v37, %s1894_s20 }
 0xb02   :  { %80 = vperm.xlu0 %1733, %v49_v3  }
 0xb70   :  { %v880_v43 = vpop.permute.xlu0 %879 }
 0xb71   :  { %v882_v44 = vadd.f32 %v880_v43, %v872_v42 }
 0xb73   :  { %1789 = vtanh.f32 %v882_v44 }
 0xb74   :  { %1791 = vpow2.f32 %v1564_v52 }
 0xb7d   :  { %v1790_v45 = vpop.eup %1789 }
 0xb7e   :  { %885 = vrot.lane.b32.xlu1 %v1790_v45, %s1894_s20  ;;  %v1792_v53 = vpop.eup %1791 }
 0xb7f   :  { %v866_v54 = vadd.f32 1.0, %v1792_v53 }
 0xb81   :  { %v81_v46 = vpop.permute.xlu0 %80  ;;  %1793 = vrcp.f32 %v866_v54 }
 0xb82   :  { %v119_v47 = vmul.f32 %v2056_v38, %v81_v46  ;;  %v120_v48 = vmul.f32 %v2058_v39, %v81_v46 }
 0xb84   :  { %v148_v49 = vadd.f32 %v2061_v40, %v119_v47  ;;  %v149_v50 = vadd.f32 %v2063_v41, %v120_v48 }
 0xb86   :  { %v214_v51 = vcombine.low %v148_v49, %v149_v50 }
 0xb88   :  { %1539 = vst.sshfl [vmem:[#allocation2 + $0x14] sm:$0x33 pattern:$0x76325410] %v214_v51 }
 0xb8b   :  { %v1794_v55 = vpop.eup %1793 }
 0xb8f   :  { %v1565_v58 = vld.sshfl [vmem:[#allocation2 + $0x14] sm:$0x33 pattern:$0x76325410] }
 0xb90   :  { %v901_v60 = vcombine.high %v1565_v58, %v1565_v58 }
 0xbf0   :  { %v886_v56 = vpop.permute.xlu1 %885 }
 0xbf1   :  { %v888_v57 = vmul.f32 %v1794_v55, %v886_v56 }
 0xbf3   :  { %890 = vst.msk [vmem:[#allocation3 + $0x6] sm:$0x3] %vm532_vm3, %v888_v57  ;;  %1566 = vmatmul.mubr.msk.f32.vlgmr.msra.gmra.mrb[4].mxu1 %vm293_vm1, %v888_v57 }
 0xbf4   :  { %1696 = vmatpush1.bf16.msra.mxu1 %v1955_v7  ;;  %1209 = vmatprep.mubr.f32.mxu1 %v1892_v11 }
 0xbf5   :  { %1698 = vmatprep.subr.bf16.mxu1 %v1968_v13 }
 0xbf8   :  { %1700 = vmatpush1.bf16.msra.mxu1 %v1978_v16 }
 0xbf9   :  { %1702 = vmatprep.subr.bf16.mxu1 %v1985_v18 }
 0xbfc   :  { %1704 = vmatpush1.bf16.msra.mxu1 %v2006_v24 }
 0xbfd   :  { %1706 = vmatprep.subr.bf16.mxu1 %v2009_v25 }
 0xc00   :  { %1708 = vmatpush1.bf16.msra.mxu1 %v2020_v28 }
 0xcc6   :  { %v973_v59 = vpop.f32.mrb[4].mxu1 }
 0xcc7   :  { %v975_v61 = vpop.f32.mrb[5].mxu1  ;;  %v974_v0 = vadd.f32 %v1565_v58, %v973_v59 }
 0xcc8   :  { %v976_v62 = vadd.f32 %v975_v61, %v901_v60 }
 0xcc9   :  { %v1567_v1 = vmul.f32 -1.442695, %v974_v0 }
 0xcca   :  { %1795 = vtanh.f32 %v976_v62  ;;  %v1568_v27 = vmul.f32 -1.442695, %v976_v62 }
 0xccb   :  { %1797 = vpow2.f32 %v1567_v1 }
 0xcd4   :  { %v1796_v63 = vpop.eup %1795 }
 0xcd5   :  { %993 = vrot.lane.b32.xlu1 %v1796_v63, %s1894_s20  ;;  %v1798_v2 = vpop.eup %1797 }
 0xcd6   :  { %v984_v4 = vadd.f32 1.0, %v1798_v2 }
 0xcd8   :  { %1799 = vrcp.f32 %v984_v4 }
 0xce2   :  { %v1800_v5 = vpop.eup %1799 }
 0xce3   :  { %v991_v10 = vmul.f32 %v1800_v5, %v882_v44 }
 0xd47   :  { %v994_v6 = vpop.permute.xlu1 %993 }
 0xd48   :  { %v996_v8 = vmul.f32 %v1800_v5, %v994_v6 }
 0xd4a   :  { %998 = vrot.lane.b32.xlu0 %v996_v8, %s1894_s20 }
 0xd4e   :  { %85 = vperm.xlu0 %1733, %v50_v9  }
 0xdbc   :  { %v999_v12 = vpop.permute.xlu0 %998 }
 0xdbd   :  { %v1001_v14 = vadd.f32 %v999_v12, %v991_v10  ;;  %v52_v12 = vld [vmem:[%s2292_s0 + $0x10] sm:$0x3] }
 0xdbf   :  { %1801 = vtanh.f32 %v1001_v14 }
 0xdc0   :  { %1803 = vpow2.f32 %v1568_v27 }
 0xdc9   :  { %v1802_v15 = vpop.eup %1801 }
 0xdca   :  { %1004 = vrot.lane.b32.xlu1 %v1802_v15, %s1894_s20  ;;  %v1804_v29 = vpop.eup %1803 }
 0xdcb   :  { %v985_v30 = vadd.f32 1.0, %v1804_v29 }
 0xdcd   :  { %v86_v17 = vpop.permute.xlu0 %85  ;;  %1805 = vrcp.f32 %v985_v30 }
 0xdce   :  { %v121_v19 = vmul.f32 %v2056_v38, %v86_v17  ;;  %v122_v20 = vmul.f32 %v2058_v39, %v86_v17 }
 0xdd0   :  { %v150_v22 = vadd.f32 %v2061_v40, %v121_v19  ;;  %v151_v23 = vadd.f32 %v2063_v41, %v122_v20 }
 0xdd2   :  { %v222_v26 = vcombine.low %v150_v22, %v151_v23 }
 0xdd4   :  { %1540 = vst.sshfl [vmem:[#allocation2 + $0x18] sm:$0x33 pattern:$0x76325410] %v222_v26 }
 0xdd7   :  { %v1806_v31 = vpop.eup %1805 }
 0xddb   :  { %v1569_v35 = vld.sshfl [vmem:[#allocation2 + $0x18] sm:$0x33 pattern:$0x76325410] }
 0xddc   :  { %v1020_v37 = vcombine.high %v1569_v35, %v1569_v35 }
 0xe3c   :  { %v1005_v32 = vpop.permute.xlu1 %1004 }
 0xe3d   :  { %v1007_v34 = vmul.f32 %v1806_v31, %v1005_v32 }
 0xe3f   :  { %1009 = vst.msk [vmem:[#allocation3 + $0x8] sm:$0x3] %vm532_vm3, %v1007_v34  ;;  %1570 = vmatmul.mubr.msk.f32.vlgmr.msra.gmra.mrb[6].mxu0 %vm293_vm1, %v1007_v34 }
 0xe40   :  { %1712 = vmatpush1.bf16.msra.mxu0 %v1955_v7  ;;  %1328 = vmatprep.mubr.f32.mxu0 %v1892_v11 }
 0xe41   :  { %1714 = vmatprep.subr.bf16.mxu0 %v1968_v13 }
 0xe44   :  { %1716 = vmatpush1.bf16.msra.mxu0 %v1978_v16 }
 0xe45   :  { %1718 = vmatprep.subr.bf16.mxu0 %v1985_v18 }
 0xe48   :  { %1720 = vmatpush1.bf16.msra.mxu0 %v2006_v24 }
 0xe49   :  { %1722 = vmatprep.subr.bf16.mxu0 %v2009_v25 }
 0xe4c   :  { %1724 = vmatpush1.bf16.msra.mxu0 %v2020_v28  ;;  %v51_v28 = vld [vmem:[%s2292_s0 + $0xe] sm:$0x3] }
 0xf12   :  { %v1092_v36 = vpop.f32.mrb[6].mxu0 }
 0xf13   :  { %v1094_v3 = vpop.f32.mrb[7].mxu0  ;;  %v1093_v11 = vadd.f32 %v1569_v35, %v1092_v36 }
 0xf14   :  { %v1095_v42 = vadd.f32 %v1094_v3, %v1020_v37 }
 0xf15   :  { %v1571_v13 = vmul.f32 -1.442695, %v1093_v11 }
 0xf16   :  { %1807 = vtanh.f32 %v1095_v42  ;;  %v1572_v54 = vmul.f32 -1.442695, %v1095_v42 }
 0xf17   :  { %1809 = vpow2.f32 %v1571_v13 }
 0xf20   :  { %v1808_v7 = vpop.eup %1807 }
 0xf21   :  { %1112 = vrot.lane.b32.xlu1 %v1808_v7, %s1894_s20  ;;  %v1810_v16 = vpop.eup %1809 }
 0xf22   :  { %v1103_v18 = vadd.f32 1.0, %v1810_v16 }
 0xf24   :  { %1811 = vrcp.f32 %v1103_v18 }
 0xf2e   :  { %v1812_v24 = vpop.eup %1811 }
 0xf2f   :  { %v1110_v44 = vmul.f32 %v1812_v24, %v1001_v14 }
 0xf93   :  { %v1113_v43 = vpop.permute.xlu1 %1112 }
 0xf94   :  { %v1115_v25 = vmul.f32 %v1812_v24, %v1113_v43  ;;  %v42_v43 = vld [vmem:[%s2295_s3 + $0x82] ss:$0 sm:$0xff] }
 0xf96   :  { %1117 = vrot.lane.b32.xlu0 %v1115_v25, %s1894_s20  ;;  %v1386_v25 = vld [vmem:[#allocation3] sm:$0x3] }
 0xf9a   :  { %90 = vperm.xlu0 %1733, %v51_v28   ;;  %v1394_v28 = vmul.f32 %v1386_v25, %v42_v43 }
0x1008   :  { %v1118_v45 = vpop.permute.xlu0 %1117 }
0x1009   :  { %v1120_v46 = vadd.f32 %v1118_v45, %v1110_v44  ;;  %v1388_v44 = vld [vmem:[#allocation3 + $0x4] sm:$0x3]  ;;  %v1402_v45 = vsel %vm532_vm3, %v1394_v28, 0.0 }
0x100b   :  { %1813 = vtanh.f32 %v1120_v46 }
0x100c   :  { %1815 = vpow2.f32 %v1572_v54 }
0x1015   :  { %v1814_v47 = vpop.eup %1813 }
0x1016   :  { %1123 = vrot.lane.b32.xlu1 %v1814_v47, %s1894_s20  ;;  %v1816_v55 = vpop.eup %1815  ;;  %v1389_v47 = vld [vmem:[#allocation3 + $0x6] sm:$0x3] }
0x1017   :  { %v1104_v56 = vadd.f32 1.0, %v1816_v55 }
0x1019   :  { %v91_v48 = vpop.permute.xlu0 %90  ;;  %1817 = vrcp.f32 %v1104_v56 }
0x101a   :  { %v123_v49 = vmul.f32 %v2056_v38, %v91_v48  ;;  %v124_v50 = vmul.f32 %v2058_v39, %v91_v48 }
0x101c   :  { %v152_v51 = vadd.f32 %v2061_v40, %v123_v49  ;;  %v153_v52 = vadd.f32 %v2063_v41, %v124_v50  ;;  %v1397_v49 = vmul.f32 %v1389_v47, %v42_v43 }
0x101e   :  { %v230_v53 = vcombine.low %v152_v51, %v153_v52  ;;  %v1411_v51 = vsel %vm532_vm3, %v1397_v49, 0.0 }
0x1020   :  { %1541 = vst.sshfl [vmem:[#allocation2 + $0x1c] sm:$0x33 pattern:$0x76325410] %v230_v53 }
0x1023   :  { %v1818_v57 = vpop.eup %1817 }
0x1027   :  { %v1573_v60 = vld.sshfl [vmem:[#allocation2 + $0x1c] sm:$0x33 pattern:$0x76325410] }
0x1028   :  { %v1139_v62 = vcombine.high %v1573_v60, %v1573_v60 }
0x1088   :  { %v1124_v58 = vpop.permute.xlu1 %1123 }
0x1089   :  { %v1126_v59 = vmul.f32 %v1818_v57, %v1124_v58  ;;  %v1387_v58 = vld [vmem:[#allocation3 + $0x2] sm:$0x3] }
0x108b   :  { %1128 = vst.msk [vmem:[#allocation3 + $0xa] sm:$0x3] %vm532_vm3, %v1126_v59  ;;  %1574 = vmatmul.mubr.msk.f32.vlgmr.msra.gmra.mrb[6].mxu1 %vm293_vm1, %v1126_v59  ;;  %v1395_v59 = vmul.f32 %v1387_v58, %v42_v43 }
0x1092   :  { %v1391_v50 = vld [vmem:[#allocation3 + $0xa] sm:$0x3] }
0x1093   :  { %v1399_v52 = vmul.f32 %v1391_v50, %v42_v43 }
0x1095   :  { %v1417_v53 = vsel %vm532_vm3, %v1399_v52, 0.0 }
0x115e   :  { %v1211_v61 = vpop.f32.mrb[6].mxu1 }
0x115f   :  { %v1213_v63 = vpop.f32.mrb[7].mxu1  ;;  %v1212_v2 = vadd.f32 %v1573_v60, %v1211_v61  ;;  %v1390_v60 = vld [vmem:[#allocation3 + $0x8] sm:$0x3]  ;;  %v1405_v61 = vsel %vm532_vm3, %v1395_v59, 0.0 }
0x1160   :  { %v1214_v0 = vadd.f32 %v1213_v63, %v1139_v62  ;;  %v1398_v62 = vmul.f32 %v1390_v60, %v42_v43 }
0x1161   :  { %v1575_v4 = vmul.f32 -1.442695, %v1212_v2 }
0x1162   :  { %1819 = vtanh.f32 %v1214_v0  ;;  %v1576_v30 = vmul.f32 -1.442695, %v1214_v0  ;;  %v1414_v0 = vsel %vm532_vm3, %v1398_v62, 0.0 }
0x1163   :  { %1821 = vpow2.f32 %v1575_v4  ;;  %v43_v4 = vld [vmem:[%s2295_s3 + $0x83] ss:$0 sm:$0xff]  ;;  %s1896_s3 = smov [#allocation4]  }
0x1164   :  { %s1503_s16 = sshll.u32 %s1896_s3, 4  ;;  %s1504_s16 = int_to_ptr.vmem [resolvable:$true] %s1503_s16 }
0x1165   :  { %s1843_s17 = scalar_lea.vmem %s1504_s16, 64  ;;  %p1848_p1 = scmp.lt.s32.totalorder %s1504_s16, %s1504_s16 }
0x1166   :  { %p1844_p0 = scmp.ne.s32.totalorder %s1504_s16, %s1843_s17  ;;  %p1849_p2 = scmp.lt.s32.totalorder %s1843_s17, %s1843_s17 }
0x1168   :  { %p1850_p3 = por %p1849_p2, %p1848_p1 }
0x116a   :  { %p1851_p4 = pnand %p1850_p3, %p1844_p0 }
0x116c   :  { %v1820_v1 = vpop.eup %1819 }
0x116d   :  { %1231 = vrot.lane.b32.xlu1 %v1820_v1, %s1894_s20  ;;  %v1822_v5 = vpop.eup %1821 }
0x116e   :  { %v1222_v6 = vadd.f32 1.0, %v1822_v5 }
0x1170   :  { %1823 = vrcp.f32 %v1222_v6 }
0x117a   :  { %v1824_v8 = vpop.eup %1823 }
0x117b   :  { %v1229_v14 = vmul.f32 %v1824_v8, %v1120_v46  ;;  %v1396_v46 = vmul.f32 %v1388_v44, %v42_v43 }
0x117d   :  { %v1408_v48 = vsel %vm532_vm3, %v1396_v46, 0.0 }
0x11df   :  { %v1232_v9 = vpop.permute.xlu1 %1231 }
0x11e0   :  { %v1234_v10 = vmul.f32 %v1824_v8, %v1232_v9 }
0x11e2   :  { %1236 = vrot.lane.b32.xlu0 %v1234_v10, %s1894_s20 }
0x11e6   :  { %95 = vperm.xlu0 %1733, %v52_v12  }
0x1254   :  { %v1237_v15 = vpop.permute.xlu0 %1236 }
0x1255   :  { %v2221_v17 = vadd.f32 %v1237_v15, %v1229_v14 }
0x1257   :  { %1825 = vtanh.f32 %v2221_v17 }
0x1258   :  { %1827 = vpow2.f32 %v1576_v30 }
0x1261   :  { %v1826_v19 = vpop.eup %1825 }
0x1262   :  { %1242 = vrot.lane.b32.xlu1 %v1826_v19, %s1894_s20  ;;  %v1828_v31 = vpop.eup %1827 }
0x1263   :  { %v1223_v32 = vadd.f32 1.0, %v1828_v31 }
0x1265   :  { %v96_v20 = vpop.permute.xlu0 %95  ;;  %1829 = vrcp.f32 %v1223_v32 }
0x1266   :  { %v125_v22 = vmul.f32 %v2056_v38, %v96_v20  ;;  %v126_v23 = vmul.f32 %v2058_v39, %v96_v20 }
0x1268   :  { %v154_v26 = vadd.f32 %v2061_v40, %v125_v22  ;;  %v155_v27 = vadd.f32 %v2063_v41, %v126_v23 }
0x126a   :  { %v238_v29 = vcombine.low %v154_v26, %v155_v27 }
0x126c   :  { %1542 = vst.sshfl [vmem:[#allocation2 + $0x20] sm:$0x33 pattern:$0x76325410] %v238_v29 }
0x126f   :  { %v1830_v34 = vpop.eup %1829 }
0x1273   :  { %v1577_v38 = vld.sshfl [vmem:[#allocation2 + $0x20] sm:$0x33 pattern:$0x76325410] }
0x1274   :  { %v1258_v40 = vcombine.high %v1577_v38, %v1577_v38 }
0x12d4   :  { %v1243_v35 = vpop.permute.xlu1 %1242 }
0x12d5   :  { %v1245_v36 = vmul.f32 %v1830_v34, %v1243_v35 }
0x12d7   :  { %1247 = vst.msk [vmem:[#allocation3 + $0xc] sm:$0x3] %vm532_vm3, %v1245_v36  ;;  %1578 = vmatmul.mubr.msk.f32.vlgmr.msra.gmra.mrb[8].mxu0 %vm293_vm1, %v1245_v36 }
0x12d8   :  { %1368 = vst.msk [vmem:[#allocation4] sm:$0x3] %vm1367_vm4, %v1245_v36 }
0x12de   :  { %v1392_v63 = vld [vmem:[#allocation3 + $0xc] sm:$0x3] }
0x12df   :  { %v1400_v1 = vmul.f32 %v1392_v63, %v42_v43 }
0x12e1   :  { %v1420_v2 = vsel %vm532_vm3, %v1400_v1, 0.0 }
0x13aa   :  { %v1330_v39 = vpop.f32.mrb[8].mxu0 }
0x13ab   :  { %v1332_v41 = vpop.f32.mrb[9].mxu0  ;;  %v1331_v42 = vadd.f32 %v1577_v38, %v1330_v39 }
0x13ac   :  { %v1333_v37 = vadd.f32 %v1332_v41, %v1258_v40 }
0x13ad   :  { %v1579_v7 = vmul.f32 -1.442695, %v1331_v42 }
0x13ae   :  { %1831 = vtanh.f32 %v1333_v37  ;;  %v1580_v5 = vmul.f32 -1.442695, %v1333_v37 }
0x13af   :  { %1833 = vpow2.f32 %v1579_v7 }
0x13b8   :  { %v1832_v3 = vpop.eup %1831 }
0x13b9   :  { %1350 = vrot.lane.b32.xlu1 %v1832_v3, %s1894_s20  ;;  %v1834_v11 = vpop.eup %1833 }
0x13ba   :  { %v1341_v13 = vadd.f32 1.0, %v1834_v11 }
0x13bc   :  { %1835 = vrcp.f32 %v1341_v13 }
0x13c6   :  { %v1836_v16 = vpop.eup %1835 }
0x13c7   :  { %v1348_v54 = vmul.f32 %v1836_v16, %v2221_v17 }
0x142b   :  { %v1351_v18 = vpop.permute.xlu1 %1350 }
0x142c   :  { %v1353_v24 = vmul.f32 %v1836_v16, %v1351_v18 }
0x142e   :  { %1355 = vrot.lane.b32.xlu0 %v1353_v24, %s1894_s20 }
0x144d   :  { %1403 = vadd.xlane.f32.xlu0 %v1402_v45 }
0x1451   :  { %1409 = vadd.xlane.f32.xlu0 %v1408_v48 }
0x1455   :  { %1412 = vadd.xlane.f32.xlu0 %v1411_v51 }
0x1459   :  { %1418 = vadd.xlane.f32.xlu0 %v1417_v53 }
0x14a0   :  { %v1356_v55 = vpop.permute.xlu0 %1355 }
0x14a1   :  { %v1358_v56 = vadd.f32 %v1356_v55, %v1348_v54 }
0x14a3   :  { %1837 = vtanh.f32 %v1358_v56 }
0x14a4   :  { %1839 = vpow2.f32 %v1580_v5 }
0x14ad   :  { %v1838_v57 = vpop.eup %1837 }
0x14ae   :  { %1361 = vrot.lane.b32.xlu1 %v1838_v57, %s1894_s20  ;;  %v1840_v6 = vpop.eup %1839 }
0x14af   :  { %v1342_v8 = vadd.f32 1.0, %v1840_v6 }
0x14b1   :  { %1841 = vrcp.f32 %v1342_v8 }
0x14bb   :  { %v1842_v9 = vpop.eup %1841 }
0x14d2   :  { %1406 = vadd.xlane.f32.xlu1 %v1405_v61 }
0x14d6   :  { %1415 = vadd.xlane.f32.xlu1 %v1414_v0 }
0x14da   :  { %1421 = vadd.xlane.f32.xlu1 %v1420_v2 }
0x14eb   :  { %1428 = vperm.xlu1 %1734, %v43_v4  }
0x1520   :  { %v1362_v10 = vpop.permute.xlu1 %1361 }
0x1521   :  { %v1364_v12 = vmul.f32 %v1842_v9, %v1362_v10 }
0x1523   :  { %1366 = vst.msk [vmem:[#allocation3 + $0xe] sm:$0x3] %vm532_vm3, %v1364_v12  ;;  %1375 = vrot.lane.b32.xlu1 %v1364_v12, %s1895_s15 }
0x1527   :  { %1381 = vrot.lane.b32.xlu1 %v1358_v56, %s1891_s27 }
0x152a   :  { %v1393_v14 = vld [vmem:[#allocation3 + $0xe] sm:$0x3] }
0x152b   :  { %v1401_v15 = vmul.f32 %v1393_v14, %v42_v43 }
0x152d   :  { %v1423_v19 = vsel %vm532_vm3, %v1401_v15, 0.0 }
0x152e   :  { %1424 = vadd.xlane.f32.xlu0 %v1423_v19 }
0x1544   :  { %1370 = vrot.lane.b32.xlu0 %v2221_v17, %s1894_s20 }
0x155f   :  { %v1407_v20 = vpop.xlane.xlu1 %1406 }
0x1563   :  { %v1416_v22 = vpop.xlane.xlu1 %1415 }
0x1567   :  { %v1422_v23 = vpop.xlane.xlu1 %1421 }
0x156b   :  { %v1429_v26 = vpop.permute.xlu1 %1428 }
0x1595   :  { %v1376_v27 = vpop.permute.xlu1 %1375 }
0x1596   :  { %1379 = vst.msk [vmem:[#allocation4 + $0x2] sm:$0x3] %vm1367_vm4, %v1376_v27 }
0x1597   :  { %1854 = shalt.err (!%p1851_p4)
}
0x1598   :  { %s1855_s20 = scalar_lea.hbm %s2297_s5, 64 }
0x1599   :  { %p1856_p5 = scmp.ne.s32.totalorder %s2297_s5, %s1855_s20  ;;  %p1859_p6 = scmp.lt.u32.totalorder %s1855_s20, %s2297_s5 }
0x159b   :  { %p1861_p7 = pnand %p1859_p6, %p1856_p5 }
0x159d   :  { %1864 = shalt.err (!%p1861_p7)
}
0x159e   :  { %s1897_s24 = smov 2   ;;  %v1382_v17 = vpop.permute.xlu1 %1381  ;;  %v1404_v29 = vpop.xlane.xlu0 %1403  ;;  %v1449_v30 = vsub.s32 %v2086_v21, %v2042_v33  ;;  %v1432_v32 = vadd.f32 %v1429_v26, %v1407_v20  ;;  %vm1479_vm5 = vcmask 1041409   ;;  %vm1481_vm6 = vcmask 1042434  }
0x159f   :  { %1509 = dma.vmem_to_hbm [thread:$0]  %s1504_s16, 64, %s2297_s5, [#allocation5], %s1891_s27, %s1891_s27, %s1897_s24   ;;  %1385 = vst.msk [vmem:[#allocation6 + $0x2] sm:$0x3] %vm1367_vm4, %v1382_v17  ;;  %v1431_v31 = vadd.f32 %v1429_v26, %v1404_v29  ;;  %v1435_v3 = vadd.f32 %v1429_v26, %v1416_v22  ;;  %vm1483_vm7 = vcmask 1043459   ;;  %vm1485_vm8 = vcmask 1044484  }
0x15a0   :  { %v1454_v38 = vrot.slane %v1432_v32, %v1449_v30  ;;  %v1437_v21 = vadd.f32 %v1429_v26, %v1422_v23  ;;  %vm1487_vm9 = vcmask 1045509   ;;  %s1898_s5 = smov [#allocation6]   ;;  %vm1489_vm10 = vcmask 1046534  }
0x15a1   :  { %v1450_v36 = vrot.slane %v1431_v31, %v1449_v30  ;;  %v1466_v33 = vrot.slane %v1435_v3, %v1449_v30  ;;  %s1515_s28 = sshll.u32 %s1898_s5, 4  ;;  %vm1491_vm11 = vcmask 1047559   ;;  %vm1494_vm12 = vcmask 15360   ;;  %s1516_s28 = int_to_ptr.vmem [resolvable:$true] %s1515_s28 }
0x15a2   :  { %v1410_v34 = vpop.xlane.xlu0 %1409  ;;  %v1474_v44 = vrot.slane %v1437_v21, %v1449_v30  ;;  %s1865_s7 = scalar_lea.vmem %s1516_s28, 64  ;;  %p1870_p9 = scmp.lt.s32.totalorder %s1516_s28, %s1516_s28 }
0x15a3   :  { %v1433_v35 = vadd.f32 %v1429_v26, %v1410_v34  ;;  %v1480_v37 = vsel %vm1479_vm5, %v1454_v38, %v1450_v36  ;;  %p1866_p8 = scmp.ne.s32.totalorder %s1516_s28, %s1865_s7  ;;  %p1871_p10 = scmp.lt.s32.totalorder %s1865_s7, %s1865_s7 }
0x15a5   :  { %v1458_v40 = vrot.slane %v1433_v35, %v1449_v30  ;;  %p1872_p11 = por %p1871_p10, %p1870_p9 }
0x15a6   :  { %v1413_v39 = vpop.xlane.xlu0 %1412 }
0x15a7   :  { %v1434_v41 = vadd.f32 %v1429_v26, %v1413_v39  ;;  %v1482_v42 = vsel %vm1481_vm6, %v1458_v40, %v1480_v37  ;;  %p1873_p12 = pnand %p1872_p11, %p1866_p8 }
0x15a9   :  { %v1462_v7 = vrot.slane %v1434_v41, %v1449_v30 }
0x15aa   :  { %v1419_v11 = vpop.xlane.xlu0 %1418 }
0x15ab   :  { %v1436_v13 = vadd.f32 %v1429_v26, %v1419_v11  ;;  %v1484_v16 = vsel %vm1483_vm7, %v1462_v7, %v1482_v42 }
0x15ac   :  { %v1486_v18 = vsel %vm1485_vm8, %v1466_v33, %v1484_v16 }
0x15ad   :  { %v1470_v24 = vrot.slane %v1436_v13, %v1449_v30 }
0x15af   :  { %v1488_v25 = vsel %vm1487_vm9, %v1470_v24, %v1486_v18 }
0x15b0   :  { %v1490_v46 = vsel %vm1489_vm10, %v1474_v44, %v1488_v25 }
0x15bb   :  { %v1425_v43 = vpop.xlane.xlu0 %1424 }
0x15bc   :  { %v1438_v28 = vadd.f32 %v1429_v26, %v1425_v43 }
0x15be   :  { %v1478_v45 = vrot.slane %v1438_v28, %v1449_v30 }
0x15bf   :  { %v1371_v47 = vpop.permute.xlu0 %1370 }
0x15c0   :  { %v1492_v48 = vsel %vm1491_vm11, %v1478_v45, %v1490_v46  ;;  %1373 = vst.msk [vmem:[#allocation6] sm:$0x3] %vm1367_vm4, %v1371_v47 }
0x15c1   :  { %1495 = vst.msk [vmem:[%s2296_s4] sm:$0xff] %vm1494_vm12, %v1492_v48 }
0x15c2   :  { %1876 = shalt.err (!%p1873_p12)
}
0x15c3   :  { %s1877_s10 = scalar_lea.hbm %s2298_s6, 64 }
0x15c4   :  { %p1878_p13 = scmp.ne.s32.totalorder %s2298_s6, %s1877_s10  ;;  %p1881_p0 = scmp.lt.u32.totalorder %s1877_s10, %s2298_s6 }
0x15c6   :  { %p1883_p1 = pnand %p1881_p0, %p1878_p13 }
0x15c8   :  { %1886 = shalt.err (!%p1883_p1)
}
0x15c9   :  { %1521 = dma.vmem_to_hbm [thread:$0]  %s1516_s28, 64, %s2298_s6, [#allocation7], %s1891_s27, %s1891_s27, %s1897_s24  }
0x15ca   :  { %1887 = dma.done.wait [#allocation5], 64  }
0x15cb   :  { %1888 = vsyncadd [#allocation5], 4294967232 }
0x15cc   :  { %1889 = dma.done.wait [#allocation7], 64  }
0x15cd   :  { %1890 = vsyncadd [#allocation7], 4294967232 }
0x15ce   :  { %1530 = vsyncpa [#allocation5], 1 }
0x15cf   :  { %1531 = vsyncpa [#allocation7], 1 }

</bundles_post_ra>
